<compile_context>
chip_gen: v5e
topology: v5e:2x2
jax: 0.10.0
libtpu: 0.0.40
codegen_flags: <defaults>
</compile_context>

<pallas_src>
import jax
import jax.numpy as jnp
from jax.experimental import pallas as pl
from jax.experimental.pallas import tpu as pltpu

# MLP dims from the module: 3 -> 64 -> 128 -> 256 -> 512 -> 256 -> 2
DIMS = [3, 64, 128, 256, 512, 256, 2]
FEAT = DIMS[-2]  # 256 pooled-feature width


def pointnet_kernel(x_ref,
                    w1, b1, w2, b2, w3, b3, w4, b4, w5, b5,
                    out_ref):
    n_tile = pl.program_id(2)

    x = x_ref[0]  # (TN, 3) f32

    # ---- layer 1 (3 -> 64) on the VPU: three broadcast FMAs (no K=3 matmul).
    w1f = w1[...]  # (3, 64) f32
    h = (x[:, 0:1] * w1f[0:1, :]
         + x[:, 1:2] * w1f[1:2, :]
         + x[:, 2:3] * w1f[2:3, :]
         + b1[...])
    h = jnp.maximum(h, 0.0).astype(jnp.bfloat16)  # (TN, 64) bf16

    # ---- layers 2-5 on the MXU: bf16 operands, f32 accumulation.
    def lin(h_bf16, w_ref, b_ref):
        return jnp.dot(h_bf16, w_ref[...],
                       preferred_element_type=jnp.float32) + b_ref[...]

    # bf16 activations between layers (ReLU commutes with the bf16 cast).
    h = jnp.maximum(lin(h, w2, b2).astype(jnp.bfloat16), 0.0)   # (TN, 128) bf16
    h = jnp.maximum(lin(h, w3, b3).astype(jnp.bfloat16), 0.0)   # (TN, 256) bf16
    h = jnp.maximum(lin(h, w4, b4).astype(jnp.bfloat16), 0.0)   # (TN, 512) bf16
    h = jnp.maximum(lin(h, w5, b5), 0.0)                        # (TN, 256) f32

    # ---- running max over the point axis (output block resident across tiles).
    @pl.when(n_tile == 0)
    def _():
        # Layer-5 output is post-ReLU (>= 0), so 0-init == -inf-init and is
        # robust if padded/ragged N is ever added.
        out_ref[...] = jnp.zeros_like(out_ref)

    tile_max = jnp.max(h, axis=0, keepdims=True)                    # (1, 256)
    out_ref[...] = jnp.maximum(out_ref[...], tile_max.reshape(1, 1, FEAT))


def _vmem_limit_bytes(tn):
    """Explicit scoped-VMEM limit for big tiles, re-derived per generation."""
    if tn < 2048:
        return None  # compiler default is plenty
    try:
        cap = pltpu.get_tpu_info().vmem_capacity_bytes
    except Exception:
        cap = 64 << 20  # conservative (v7x-sized) fallback
    # Half of physical VMEM: 64 MiB on v5e/v6e (past v5e's 16 MiB default),
    # 32 MiB on v7x (leaves headroom on the 64 MiB part).
    return min(cap // 2, 64 << 20)


def pointnet_forward(x, params, tn=None, core_split=None):
    """x: (B, N, 3) float32. params: list of 6 (W_i, b_i), W_i (in, out), b_i (1, out)."""
    B, N, c_in = x.shape
    assert c_in == 3
    assert len(params) == 6

    # v7x megacore: "parallel" on the batch axis alone only fills both
    # TensorCores when B >= 2 and even.  For B == 1 / odd B, split the point
    # axis across a size-2 "parallel" grid axis and fold the two partial maxes
    # in the epilogue.  Harmless no-op on single-TC v5e/v6e.
    if core_split is None:
        core_split = 2 if (B % 2 == 1 and N % 16 == 0) else 1
    assert N % core_split == 0
    n_per_core = N // core_split

    # Large point tile: the kernel is MXU-bound, so TN mostly amortizes the
    # ~0.35 us per-grid-step overhead.  TN=4096 of bf16 activations is
    # ~10-14 MiB live, safe even on v7x's 64 MiB VMEM.
    if tn is None:
        tn = min(n_per_core, 4096)
        while n_per_core % tn != 0:
            tn //= 2
    assert n_per_core % tn == 0 and (tn % 8 == 0 or tn == N), (
        "point tile must divide N and be a multiple of 8 "
        "(awkward/prime point counts are unsupported)", N, tn)
    nt = n_per_core // tn

    (w1, b1), (w2, b2), (w3, b3), (w4, b4), (w5, b5), (w6, b6) = params

    # MXU-layer weights in bf16 (halves weight DMA + VMEM); layer-1 (VPU)
    # weights and all biases stay f32.
    w2b = w2.astype(jnp.bfloat16)
    w3b = w3.astype(jnp.bfloat16)
    w4b = w4.astype(jnp.bfloat16)
    w5b = w5.astype(jnp.bfloat16)
    # TODO(synk): optionally quantize w4/w5 + layer-3/4 activations to fp8 on
    # v7x if measured fp8 vmatmul rate beats bf16 (not assumed here).

    in_specs = [
        pl.BlockSpec((1, tn, 3), lambda b, c, n: (b, c * nt + n, 0)),  # x tile
        pl.BlockSpec((3, 64),    lambda b, c, n: (0, 0)),              # w1 (f32, VPU)
        pl.BlockSpec((1, 64),    lambda b, c, n: (0, 0)),              # b1
        pl.BlockSpec((64, 128),  lambda b, c, n: (0, 0)),              # w2 (bf16)
        pl.BlockSpec((1, 128),   lambda b, c, n: (0, 0)),              # b2
        pl.BlockSpec((128, 256), lambda b, c, n: (0, 0)),              # w3 (bf16)
        pl.BlockSpec((1, 256),   lambda b, c, n: (0, 0)),              # b3
        pl.BlockSpec((256, 512), lambda b, c, n: (0, 0)),              # w4 (bf16)
        pl.BlockSpec((1, 512),   lambda b, c, n: (0, 0)),              # b4
        pl.BlockSpec((512, 256), lambda b, c, n: (0, 0)),              # w5 (bf16)
        pl.BlockSpec((1, 256),   lambda b, c, n: (0, 0)),              # b5
    ]
    out_spec = pl.BlockSpec((1, 1, FEAT), lambda b, c, n: (b, c, 0))

    flops = 2 * B * N * sum(DIMS[i] * DIMS[i + 1] for i in range(5))
    weight_args = (w1, b1, w2b, b2, w3b, b3, w4b, b4, w5b, b5)
    bytes_accessed = (x.size * x.dtype.itemsize
                      + sum(a.size * a.dtype.itemsize for a in weight_args)
                      + B * core_split * FEAT * 4)

    pooled = pl.pallas_call(
        pointnet_kernel,
        out_shape=jax.ShapeDtypeStruct((B, core_split, FEAT), jnp.float32),
        grid_spec=pltpu.PrefetchScalarGridSpec(
            num_scalar_prefetch=0,
            grid=(B, core_split, nt),
            in_specs=in_specs,
            out_specs=out_spec,
        ),
        compiler_params=pltpu.CompilerParams(
            dimension_semantics=("parallel", "parallel", "arbitrary"),
            vmem_limit_bytes=_vmem_limit_bytes(tn)),
        cost_estimate=pl.CostEstimate(
            flops=flops, transcendentals=0, bytes_accessed=bytes_accessed),
    )(x, *weight_args)                                   # (B, core_split, 256)

    # Fold the per-core partial maxes, then the tiny (256 -> 2) linear as one
    # batched XLA matmul (keeps the kernel output lane-dense).
    pooled = jnp.max(pooled, axis=1, keepdims=True)      # (B, 1, 256)
    return pooled @ w6 + b6                              # (B, 1, 2)


def init_params(key):
    """Deterministic synthetic parameters (same shapes as the PyTorch module)."""
    params = []
    for i in range(len(DIMS) - 1):
        fan_in, fan_out = DIMS[i], DIMS[i + 1]
        key, kw, kb = jax.random.split(key, 3)
        bound = 1.0 / jnp.sqrt(fan_in)
        w = jax.random.uniform(kw, (fan_in, fan_out), jnp.float32, -bound, bound)
        b = jax.random.uniform(kb, (1, fan_out), jnp.float32, -bound, bound)
        params.append((w, b))
    return params


def reference_forward(x, params):
    """Pure-JAX f32 reference mirroring the PyTorch forward."""
    h = x
    for (w, b) in params[:-1]:
        h = jnp.maximum(h @ w + b, 0.0)
    h = jnp.max(h, axis=1, keepdims=True)
    w6, b6 = params[-1]
    return h @ w6 + b6


if __name__ == "__main__":
    key = jax.random.PRNGKey(0)
    k_x, k_p = jax.random.split(key)
    params = init_params(k_p)

    # Case 1: even batch (no core split), 4 point-tiles per batch exercises the
    # running max across the "arbitrary" grid axis.
    B, N, TN = 2, 64, 16
    x = jax.random.normal(k_x, (B, N, 3), dtype=jnp.float32)
    out = jax.block_until_ready(pointnet_forward(x, params, tn=TN))
    ref = reference_forward(x, params)
    assert out.shape == (B, 1, DIMS[-1]), out.shape
    # bf16 MXU operands/activations (f32 accumulation) -> loosened tolerance.
    assert jnp.allclose(out, ref, atol=5e-2, rtol=5e-2), (out, ref)

    # Case 2: B == 1 -> automatic size-2 core split of the point axis
    # (the v7x megacore path); partial maxes folded in the epilogue.
    x1 = x[:1]
    out1 = jax.block_until_ready(pointnet_forward(x1, params, tn=TN))
    ref1 = reference_forward(x1, params)
    assert out1.shape == (1, 1, DIMS[-1]), out1.shape
    assert jnp.allclose(out1, ref1, atol=5e-2, rtol=5e-2), (out1, ref1)

    print("KERNEL_OK")
</pallas_src>

<mosaic_0001>
module attributes {stable_mosaic.version = 11 : i64} {
  func.func @pointnet_kernel(%arg0: i32, %arg1: i32, %arg2: i32, %arg3: memref<1x16x3xf32, #tpu.memory_space<vmem>>, %arg4: memref<3x64xf32, #tpu.memory_space<vmem>>, %arg5: memref<1x64xf32, #tpu.memory_space<vmem>>, %arg6: memref<64x128xbf16, #tpu.memory_space<vmem>>, %arg7: memref<1x128xf32, #tpu.memory_space<vmem>>, %arg8: memref<128x256xbf16, #tpu.memory_space<vmem>>, %arg9: memref<1x256xf32, #tpu.memory_space<vmem>>, %arg10: memref<256x512xbf16, #tpu.memory_space<vmem>>, %arg11: memref<1x512xf32, #tpu.memory_space<vmem>>, %arg12: memref<512x256xbf16, #tpu.memory_space<vmem>>, %arg13: memref<1x256xf32, #tpu.memory_space<vmem>>, %arg14: memref<1x1x256xf32, #tpu.memory_space<vmem>>) attributes {dimension_semantics = [#tpu.dimension_semantics<parallel>, #tpu.dimension_semantics<parallel>, #tpu.dimension_semantics<arbitrary>], iteration_bounds = array<i64: 2, 1, 4>, scalar_prefetch = 0 : i64, scratch_operands = 0 : i64, tpu.core_type = #tpu.core_type<tc>, window_params = [{transform_indices = @transform_0, window_bounds = array<i64: 1, 16, 3>}, {pipeline_mode = #tpu.pipeline_mode<synchronous>, transform_indices = @transform_1, window_bounds = array<i64: 3, 64>}, {pipeline_mode = #tpu.pipeline_mode<synchronous>, transform_indices = @transform_2, window_bounds = array<i64: 1, 64>}, {pipeline_mode = #tpu.pipeline_mode<synchronous>, transform_indices = @transform_3, window_bounds = array<i64: 64, 128>}, {pipeline_mode = #tpu.pipeline_mode<synchronous>, transform_indices = @transform_4, window_bounds = array<i64: 1, 128>}, {pipeline_mode = #tpu.pipeline_mode<synchronous>, transform_indices = @transform_5, window_bounds = array<i64: 128, 256>}, {pipeline_mode = #tpu.pipeline_mode<synchronous>, transform_indices = @transform_6, window_bounds = array<i64: 1, 256>}, {pipeline_mode = #tpu.pipeline_mode<synchronous>, transform_indices = @transform_7, window_bounds = array<i64: 256, 512>}, {pipeline_mode = #tpu.pipeline_mode<synchronous>, transform_indices = @transform_8, window_bounds = array<i64: 1, 512>}, {pipeline_mode = #tpu.pipeline_mode<synchronous>, transform_indices = @transform_9, window_bounds = array<i64: 512, 256>}, {pipeline_mode = #tpu.pipeline_mode<synchronous>, transform_indices = @transform_10, window_bounds = array<i64: 1, 256>}, {transform_indices = @transform_11, window_bounds = array<i64: 1, 1, 256>}]} {
    %c0 = arith.constant 0 : index
    %c0_0 = arith.constant 0 : index
    %c0_1 = arith.constant 0 : index
    %0 = vector.load %arg3[%c0, %c0_0, %c0_1] : memref<1x16x3xf32, #tpu.memory_space<vmem>>, vector<1x16x3xf32>
    %1 = vector.shape_cast %0 : vector<1x16x3xf32> to vector<16x3xf32>
    %c0_2 = arith.constant 0 : index
    %c0_3 = arith.constant 0 : index
    %2 = vector.load %arg4[%c0_2, %c0_3] : memref<3x64xf32, #tpu.memory_space<vmem>>, vector<3x64xf32>
    %3 = vector.extract_strided_slice %1 {offsets = [0, 0], sizes = [16, 1], strides = [1, 1]} : vector<16x3xf32> to vector<16x1xf32>
    %4 = vector.extract_strided_slice %2 {offsets = [0, 0], sizes = [1, 64], strides = [1, 1]} : vector<3x64xf32> to vector<1x64xf32>
    %5 = vector.broadcast %3 : vector<16x1xf32> to vector<16x64xf32>
    %6 = vector.broadcast %4 : vector<1x64xf32> to vector<16x64xf32>
    %7 = arith.mulf %5, %6 : vector<16x64xf32>
    %8 = vector.extract_strided_slice %1 {offsets = [0, 1], sizes = [16, 1], strides = [1, 1]} : vector<16x3xf32> to vector<16x1xf32>
    %9 = vector.extract_strided_slice %2 {offsets = [1, 0], sizes = [1, 64], strides = [1, 1]} : vector<3x64xf32> to vector<1x64xf32>
    %10 = vector.broadcast %8 : vector<16x1xf32> to vector<16x64xf32>
    %11 = vector.broadcast %9 : vector<1x64xf32> to vector<16x64xf32>
    %12 = arith.mulf %10, %11 : vector<16x64xf32>
    %13 = arith.addf %7, %12 : vector<16x64xf32>
    %14 = vector.extract_strided_slice %1 {offsets = [0, 2], sizes = [16, 1], strides = [1, 1]} : vector<16x3xf32> to vector<16x1xf32>
    %15 = vector.extract_strided_slice %2 {offsets = [2, 0], sizes = [1, 64], strides = [1, 1]} : vector<3x64xf32> to vector<1x64xf32>
    %16 = vector.broadcast %14 : vector<16x1xf32> to vector<16x64xf32>
    %17 = vector.broadcast %15 : vector<1x64xf32> to vector<16x64xf32>
    %18 = arith.mulf %16, %17 : vector<16x64xf32>
    %19 = arith.addf %13, %18 : vector<16x64xf32>
    %c0_4 = arith.constant 0 : index
    %c0_5 = arith.constant 0 : index
    %20 = vector.load %arg5[%c0_4, %c0_5] : memref<1x64xf32, #tpu.memory_space<vmem>>, vector<1x64xf32>
    %21 = vector.broadcast %20 : vector<1x64xf32> to vector<16x64xf32>
    %22 = arith.addf %19, %21 : vector<16x64xf32>
    %cst = arith.constant 0.000000e+00 : f32
    %23 = vector.broadcast %cst : f32 to vector<16x64xf32>
    %24 = arith.maximumf %22, %23 : vector<16x64xf32>
    %25 = arith.truncf %24 : vector<16x64xf32> to vector<16x64xbf16>
    %c0_6 = arith.constant 0 : index
    %c0_7 = arith.constant 0 : index
    %26 = vector.load %arg6[%c0_6, %c0_7] : memref<64x128xbf16, #tpu.memory_space<vmem>>, vector<64x128xbf16>
    %cst_8 = arith.constant dense<0.000000e+00> : vector<16x128xf32>
    %27 = tpu.matmul %25, %26, %cst_8 {dimension_numbers = #tpu.dot_dimension_numbers<[1], [0], [0], [1], [0, 0, 1, 1], [], []>} : vector<16x64xbf16>, vector<64x128xbf16>, vector<16x128xf32> -> vector<16x128xf32>
    %c0_9 = arith.constant 0 : index
    %c0_10 = arith.constant 0 : index
    %28 = vector.load %arg7[%c0_9, %c0_10] : memref<1x128xf32, #tpu.memory_space<vmem>>, vector<1x128xf32>
    %29 = vector.broadcast %28 : vector<1x128xf32> to vector<16x128xf32>
    %30 = arith.addf %27, %29 : vector<16x128xf32>
    %31 = arith.truncf %30 : vector<16x128xf32> to vector<16x128xbf16>
    %cst_11 = arith.constant 0.000000e+00 : bf16
    %32 = vector.broadcast %cst_11 : bf16 to vector<16x128xbf16>
    %33 = arith.maximumf %31, %32 : vector<16x128xbf16>
    %c0_12 = arith.constant 0 : index
    %c0_13 = arith.constant 0 : index
    %34 = vector.load %arg8[%c0_12, %c0_13] : memref<128x256xbf16, #tpu.memory_space<vmem>>, vector<128x256xbf16>
    %cst_14 = arith.constant dense<0.000000e+00> : vector<16x256xf32>
    %35 = tpu.matmul %33, %34, %cst_14 {dimension_numbers = #tpu.dot_dimension_numbers<[1], [0], [0], [1], [0, 0, 1, 1], [], []>} : vector<16x128xbf16>, vector<128x256xbf16>, vector<16x256xf32> -> vector<16x256xf32>
    %c0_15 = arith.constant 0 : index
    %c0_16 = arith.constant 0 : index
    %36 = vector.load %arg9[%c0_15, %c0_16] : memref<1x256xf32, #tpu.memory_space<vmem>>, vector<1x256xf32>
    %37 = vector.broadcast %36 : vector<1x256xf32> to vector<16x256xf32>
    %38 = arith.addf %35, %37 : vector<16x256xf32>
    %39 = arith.truncf %38 : vector<16x256xf32> to vector<16x256xbf16>
    %cst_17 = arith.constant 0.000000e+00 : bf16
    %40 = vector.broadcast %cst_17 : bf16 to vector<16x256xbf16>
    %41 = arith.maximumf %39, %40 : vector<16x256xbf16>
    %c0_18 = arith.constant 0 : index
    %c0_19 = arith.constant 0 : index
    %42 = vector.load %arg10[%c0_18, %c0_19] : memref<256x512xbf16, #tpu.memory_space<vmem>>, vector<256x512xbf16>
    %cst_20 = arith.constant dense<0.000000e+00> : vector<16x512xf32>
    %43 = tpu.matmul %41, %42, %cst_20 {dimension_numbers = #tpu.dot_dimension_numbers<[1], [0], [0], [1], [0, 0, 1, 1], [], []>} : vector<16x256xbf16>, vector<256x512xbf16>, vector<16x512xf32> -> vector<16x512xf32>
    %c0_21 = arith.constant 0 : index
    %c0_22 = arith.constant 0 : index
    %44 = vector.load %arg11[%c0_21, %c0_22] : memref<1x512xf32, #tpu.memory_space<vmem>>, vector<1x512xf32>
    %45 = vector.broadcast %44 : vector<1x512xf32> to vector<16x512xf32>
    %46 = arith.addf %43, %45 : vector<16x512xf32>
    %47 = arith.truncf %46 : vector<16x512xf32> to vector<16x512xbf16>
    %cst_23 = arith.constant 0.000000e+00 : bf16
    %48 = vector.broadcast %cst_23 : bf16 to vector<16x512xbf16>
    %49 = arith.maximumf %47, %48 : vector<16x512xbf16>
    %c0_24 = arith.constant 0 : index
    %c0_25 = arith.constant 0 : index
    %50 = vector.load %arg12[%c0_24, %c0_25] : memref<512x256xbf16, #tpu.memory_space<vmem>>, vector<512x256xbf16>
    %cst_26 = arith.constant dense<0.000000e+00> : vector<16x256xf32>
    %51 = tpu.matmul %49, %50, %cst_26 {dimension_numbers = #tpu.dot_dimension_numbers<[1], [0], [0], [1], [0, 0, 1, 1], [], []>} : vector<16x512xbf16>, vector<512x256xbf16>, vector<16x256xf32> -> vector<16x256xf32>
    %c0_27 = arith.constant 0 : index
    %c0_28 = arith.constant 0 : index
    %52 = vector.load %arg13[%c0_27, %c0_28] : memref<1x256xf32, #tpu.memory_space<vmem>>, vector<1x256xf32>
    %53 = vector.broadcast %52 : vector<1x256xf32> to vector<16x256xf32>
    %54 = arith.addf %51, %53 : vector<16x256xf32>
    %cst_29 = arith.constant 0.000000e+00 : f32
    %55 = vector.broadcast %cst_29 : f32 to vector<16x256xf32>
    %56 = arith.maximumf %54, %55 : vector<16x256xf32>
    %c0_i32 = arith.constant 0 : i32
    %57 = arith.cmpi eq, %arg2, %c0_i32 : i32
    %58 = arith.extui %57 : i1 to i32
    %c0_i32_30 = arith.constant 0 : i32
    %59 = arith.cmpi ne, %58, %c0_i32_30 : i32
    scf.if %59 {
      %cst_38 = arith.constant 0.000000e+00 : f32
      %66 = vector.broadcast %cst_38 : f32 to vector<1x1x256xf32>
      %c0_39 = arith.constant 0 : index
      %c0_40 = arith.constant 0 : index
      %c0_41 = arith.constant 0 : index
      %67 = vector.load %arg14[%c0_39, %c0_40, %c0_41] : memref<1x1x256xf32, #tpu.memory_space<vmem>>, vector<1x1x256xf32>
      tpu.vector_store %arg14[%c0_39, %c0_40, %c0_41], %66 {strides = array<i32>} : memref<1x1x256xf32, #tpu.memory_space<vmem>>, vector<1x1x256xf32>,
    } else {
    }
    %cst_31 = arith.constant dense<0xFF800000> : vector<256xf32>
    %60 = vector.multi_reduction <maximumf>, %56, %cst_31 [0] : vector<16x256xf32> to vector<256xf32>
    %61 = vector.shape_cast %60 : vector<256xf32> to vector<1x256xf32>
    %c0_32 = arith.constant 0 : index
    %c0_33 = arith.constant 0 : index
    %c0_34 = arith.constant 0 : index
    %62 = vector.load %arg14[%c0_32, %c0_33, %c0_34] : memref<1x1x256xf32, #tpu.memory_space<vmem>>, vector<1x1x256xf32>
    %63 = vector.shape_cast %61 : vector<1x256xf32> to vector<1x1x256xf32>
    %64 = arith.maximumf %62, %63 : vector<1x1x256xf32>
    %c0_35 = arith.constant 0 : index
    %c0_36 = arith.constant 0 : index
    %c0_37 = arith.constant 0 : index
    %65 = vector.load %arg14[%c0_35, %c0_36, %c0_37] : memref<1x1x256xf32, #tpu.memory_space<vmem>>, vector<1x1x256xf32>
    tpu.vector_store %arg14[%c0_35, %c0_36, %c0_37], %64 {strides = array<i32>} : memref<1x1x256xf32, #tpu.memory_space<vmem>>, vector<1x1x256xf32>,
    return
  }
  func.func @transform_0(%arg0: i32, %arg1: i32, %arg2: i32) -> (i32, i32, i32) {
    %c4_i32 = arith.constant 4 : i32
    %0 = arith.muli %arg1, %c4_i32 : i32
    %1 = arith.addi %0, %arg2 : i32
    %c0_i32 = arith.constant 0 : i32
    %c0_i32_0 = arith.constant 0 : i32
    return %arg0, %1, %c0_i32 : i32, i32, i32
  }
  func.func @transform_1(%arg0: i32, %arg1: i32, %arg2: i32) -> (i32, i32) {
    %c0_i32 = arith.constant 0 : i32
    %c0_i32_0 = arith.constant 0 : i32
    %c0_i32_1 = arith.constant 0 : i32
    return %c0_i32, %c0_i32_0 : i32, i32
  }
  func.func @transform_2(%arg0: i32, %arg1: i32, %arg2: i32) -> (i32, i32) {
    %c0_i32 = arith.constant 0 : i32
    %c0_i32_0 = arith.constant 0 : i32
    %c0_i32_1 = arith.constant 0 : i32
    return %c0_i32, %c0_i32_0 : i32, i32
  }
  func.func @transform_3(%arg0: i32, %arg1: i32, %arg2: i32) -> (i32, i32) {
    %c0_i32 = arith.constant 0 : i32
    %c0_i32_0 = arith.constant 0 : i32
    %c0_i32_1 = arith.constant 0 : i32
    return %c0_i32, %c0_i32_0 : i32, i32
  }
  func.func @transform_4(%arg0: i32, %arg1: i32, %arg2: i32) -> (i32, i32) {
    %c0_i32 = arith.constant 0 : i32
    %c0_i32_0 = arith.constant 0 : i32
    %c0_i32_1 = arith.constant 0 : i32
    return %c0_i32, %c0_i32_0 : i32, i32
  }
  func.func @transform_5(%arg0: i32, %arg1: i32, %arg2: i32) -> (i32, i32) {
    %c0_i32 = arith.constant 0 : i32
    %c0_i32_0 = arith.constant 0 : i32
    %c0_i32_1 = arith.constant 0 : i32
    return %c0_i32, %c0_i32_0 : i32, i32
  }
  func.func @transform_6(%arg0: i32, %arg1: i32, %arg2: i32) -> (i32, i32) {
    %c0_i32 = arith.constant 0 : i32
    %c0_i32_0 = arith.constant 0 : i32
    %c0_i32_1 = arith.constant 0 : i32
    return %c0_i32, %c0_i32_0 : i32, i32
  }
  func.func @transform_7(%arg0: i32, %arg1: i32, %arg2: i32) -> (i32, i32) {
    %c0_i32 = arith.constant 0 : i32
    %c0_i32_0 = arith.constant 0 : i32
    %c0_i32_1 = arith.constant 0 : i32
    return %c0_i32, %c0_i32_0 : i32, i32
  }
  func.func @transform_8(%arg0: i32, %arg1: i32, %arg2: i32) -> (i32, i32) {
    %c0_i32 = arith.constant 0 : i32
    %c0_i32_0 = arith.constant 0 : i32
    %c0_i32_1 = arith.constant 0 : i32
    return %c0_i32, %c0_i32_0 : i32, i32
  }
  func.func @transform_9(%arg0: i32, %arg1: i32, %arg2: i32) -> (i32, i32) {
    %c0_i32 = arith.constant 0 : i32
    %c0_i32_0 = arith.constant 0 : i32
    %c0_i32_1 = arith.constant 0 : i32
    return %c0_i32, %c0_i32_0 : i32, i32
  }
  func.func @transform_10(%arg0: i32, %arg1: i32, %arg2: i32) -> (i32, i32) {
    %c0_i32 = arith.constant 0 : i32
    %c0_i32_0 = arith.constant 0 : i32
    %c0_i32_1 = arith.constant 0 : i32
    return %c0_i32, %c0_i32_0 : i32, i32
  }
  func.func @transform_11(%arg0: i32, %arg1: i32, %arg2: i32) -> (i32, i32, i32) {
    %c0_i32 = arith.constant 0 : i32
    %c0_i32_0 = arith.constant 0 : i32
    return %arg0, %arg1, %c0_i32 : i32, i32, i32
  }
}

</mosaic_0001>

<bundles_post_ra>
// kernel: tpu_custom_call.1
= control target key start
LH: loop header
LB: loop body
LE: loop exit
PB: predicated region body
PF: predicated region fallthrough
CT: control target
= control target key end

     0   :  { %s3528_s0 = inlined_call_operand.vmem [shape: f32[2,64,3], index: 0, kind: input, shape index: {}]   ;;  %s3529_s1 = inlined_call_operand.vmem [shape: f32[3,64], index: 1, kind: input, shape index: {}]   ;;  %s3530_s2 = inlined_call_operand.hbm [shape: f32[1,64], index: 2, kind: input, shape index: {}]   ;;  %s3531_s3 = inlined_call_operand.hbm [shape: bf16[64,128], index: 3, kind: input, shape index: {}]   ;;  %s3532_s4 = inlined_call_operand.hbm [shape: f32[1,128], index: 4, kind: input, shape index: {}]   ;;  %s3533_s5 = inlined_call_operand.vmem [shape: bf16[128,256], index: 5, kind: input, shape index: {}]   ;;  %s3534_s6 = inlined_call_operand.vmem [shape: f32[1,256], index: 6, kind: input, shape index: {}]   ;;  %s3535_s7 = inlined_call_operand.hbm [shape: bf16[256,512], index: 7, kind: input, shape index: {}]   ;;  %s3536_s8 = inlined_call_operand.vmem [shape: f32[1,512], index: 8, kind: input, shape index: {}]   ;;  %s3537_s9 = inlined_call_operand.hbm [shape: bf16[512,256], index: 9, kind: input, shape index: {}]   ;;  %s3538_s10 = inlined_call_operand.vmem [shape: f32[1,256], index: 10, kind: input, shape index: {}]   ;;  %s3539_s11 = inlined_call_operand.hbm [shape: f32[2,1,256], index: 11, kind: output, shape index: {}]  }
   0x1   :  { %3550 = sst [smem:[#allocation26_spill]] %s3531_s3 }
   0x2   :  { %16 = vsyncpa [#allocation3], 0 }
   0x3   :  { %17 = vsyncpa [#allocation6], 0 }
   0x4   :  { %18 = vsyncpa [#allocation9], 0 }
   0x5   :  { %19 = vsyncpa [#allocation4], 0 }
   0x6   :  { %21 = vsyncpa [#allocation4 + $0x1], 0  ;;  %s3227_s17 = smov 0   ;;  %s3229_s18 = smov 0  }
   0x7   :  { %s3231_s19 = smov 0   ;;  %s3233_s20 = smov 0  }
   0x8   :  { %s3235_s21 = smov 0   ;;  %s3237_s22 = smov 0  }
   0x9   :  { %s3239_s23 = smov 0   ;;  %s3241_s24 = smov 0  }
   0xa LB: > { %3551 = sst [smem:[#allocation16_spill]] %s3122_s17  ;;  %s1991_s25 = sadd.s32 4294967295, %s3150_s24   ;;  %s3150_s24 = sphi %s3241_s24, %s27_s24   ;;  %s3146_s23 = sphi %s3239_s23, %s3576_s23   ;;  %s3142_s22 = sphi %s3237_s22, %s3575_s22   ;;  %s3138_s21 = sphi %s3235_s21, %s3574_s21   ;;  %s3134_s20 = sphi %s3233_s20, %s3573_s20   ;;  %s3130_s19 = sphi %s3231_s19, %s3572_s19   ;;  %s3126_s18 = sphi %s3229_s18, %s3578_s18   ;;  %s3122_s17 = sphi %s3227_s17, %s3577_s17  }
   0xb   : > { %3552 = sst [smem:[#allocation17_spill]] %s3130_s19  ;;  %s1992_s26 = sadd.s32 4294967294, %s3150_s24  }
   0xc   : > { %3553 = sst [smem:[#allocation18_spill]] %s3142_s22  ;;  %s39_s27 = sadd.s32 1, %s3142_s22 }
   0xd   : > { %3554 = sst [smem:[#allocation19_spill]] %s3146_s23  ;;  %s46_s28 = sadd.s32 1, %s3146_s23 }
   0xe   : > { %3555 = sst [smem:[#allocation20_spill]] %s3150_s24  ;;  %p40_p0 = scmp.ge.s32.totalorder %s39_s27, 4 }
   0xf   : > { %s297_s29 = sadd.s32 1, %s3130_s19  ;;  %p307_p1 = scmp.ne.s32.totalorder %s3130_s19, %s3126_s18 }
  0x10   : > { %p308_p2 = scmp.eq.s32.totalorder %s1991_s25, 7  ;;  %s3580_s27 = smov (%p40_p0, %s39_s27), 0 }
  0x11   : > { %3556 = sst [smem:[#allocation21_spill]] %s3580_s27  ;;  %s3582_s28 = smov (!%p40_p0, %s46_s28), %s3146_s23 }
  0x12   : > { %p3277_p3 = por %p308_p2, %p307_p1  ;;  %p313_p4 = scmp.ne.s32.totalorder %s3126_s18, %s3122_s17 }
  0x13   : > { %p48_p5 = scmp.ge.s32.totalorder %s3582_s28, 2  ;;  %p314_p6 = scmp.eq.s32.totalorder %s1992_s26, 7 }
  0x14   : > { %s3557_s30 = scalar_select %p3277_p3, 1, 0 }
  0x15   : > { %p1993_p7 = scmp.ge.s32.totalorder %s3150_s24, 1  ;;  %p321_p8 = scmp.lt.s32.totalorder %s3150_s24, 9 }
  0x16   : > { %3558 = sst [smem:[#allocation22_spill]] %s3557_s30  ;;  %s3584_s28 = smov (%p48_p5, %s3582_s28), 0 }
  0x17   : > { %3559 = sst [smem:[#allocation23_spill]] %s3584_s28  ;;  %p3287_p9 = por %p314_p6, %p313_p4 }
  0x18   : > { %p3291_p10 = pnand %p1993_p7, %p321_p8  ;;  %s292_s14 = ssub.s32 %s3146_s23, %s3584_s28 }
  0x19   : > { %s3560_s12 = scalar_select %p3287_p9, 1, 0 }
  0x1a   : > { %p295_p11 = scmp.eq.s32.totalorder %s292_s14, 0  ;;  %p2778_p12 = pneg %p3291_p10 }
  0x1b   : > { %3561 = sst [smem:[#allocation24_spill]] %s3560_s12  ;;  %p3299_p13 = scmp.eq.s32.totalorder %s1991_s25, 0 }
  0x1c   : > { %s3564_s3 = sld [smem:[#allocation26_spill]]  ;;  %s3152_s14 = smov [#allocation5]  }
  0x1d   : > { %s3307_s22 = scalar_select %p295_p11, %s3130_s19, %s297_s29  }
  0x1e   : > { %p3311_p0 = pnand %p3299_p13, %p2778_p12  ;;  %s349_s25 = sshll.u32 %s3152_s14, 4  ;;  %s350_s25 = int_to_ptr.vmem [resolvable:$true] %s349_s25 }
  0x1f   : > { %3565 = sst [smem:[#allocation25_spill]] %s3307_s22  ;;  %s3153_s28 = smov 64  }
  0x20   : > { %s3154_s23 = smov 4   ;;  %s379_s29 = sshll.u32 %s3535_s7, 4  ;;  %s380_s29 = int_to_ptr.hbm [resolvable:$true] %s379_s29 }
  0x21   : > { %s3156_s19 = smov 256   ;;  %s3157_s17 = smov 16  }
  0x22   : > { %s347_s27 = sshll.u32 %s3564_s3, 4  ;;  %s3155_s3 = smov [#allocation8]   ;;  %s348_s27 = int_to_ptr.hbm [resolvable:$true] %s347_s27 }
  0x23   : > { %2784 = dma.hbm_to_vmem [thread:$0]  (!%p3311_p0), %s348_s27, 512, %s350_s25, [#allocation6], %s3153_s28, %s3153_s28, %s3154_s23  }
  0x24   : > { %s381_s22 = sshll.u32 %s3155_s3, 4  ;;  %s336_s30 = sshll.u32 %s3530_s2, 4  ;;  %s382_s22 = int_to_ptr.vmem [resolvable:$true] %s381_s22  ;;  %s337_s30 = int_to_ptr.hbm [resolvable:$true] %s336_s30 }
  0x25   : > { %2790 = dma.hbm_to_vmem [thread:$0]  (!%p3311_p0), %s380_s29, 8192, %s382_s22, [#allocation9], %s3156_s19, %s3156_s19, %s3157_s17  }
  0x26   : > { %s3158_s23 = smov [#allocation2]   ;;  %s362_s16 = sshll.u32 %s3532_s4, 4  ;;  %s363_s16 = int_to_ptr.hbm [resolvable:$true] %s362_s16 }
  0x27   : > { %s338_s27 = sshll.u32 %s3158_s23, 4  ;;  %s396_s17 = sshll.u32 %s3537_s9, 4  ;;  %s339_s27 = int_to_ptr.vmem [resolvable:$true] %s338_s27  ;;  %s397_s17 = int_to_ptr.hbm [resolvable:$true] %s396_s17 }
  0x28   : > { %2781 = dma.hbm_to_vmem [thread:$0]  (!%p3311_p0), %s337_s30, 16, %s339_s27, [#allocation3]  }
  0x29   : > { %s3159_s19 = smov [#allocation7]   ;;  %s3160_s24 = smov [#allocation10]  }
  0x2a   : > { %s364_s22 = sshll.u32 %s3159_s19, 4  ;;  %s398_s29 = sshll.u32 %s3160_s24, 4  ;;  %s365_s22 = int_to_ptr.vmem [resolvable:$true] %s364_s22  ;;  %s399_s29 = int_to_ptr.vmem [resolvable:$true] %s398_s29 }
  0x2b   : > { %2787 = dma.hbm_to_vmem [thread:$0]  (!%p3311_p0), %s363_s16, 16, %s365_s22, [#allocation6]  }
  0x2c   : > { %s3161_s14 = smov 128   ;;  %s3162_s23 = smov 8  }
  0x2d   : > { %2793 = dma.hbm_to_vmem [thread:$0]  (!%p3311_p0), %s397_s17, 8192, %s399_s29, [#allocation9], %s3161_s14, %s3161_s14, %s3162_s23  }
  0x2e   : > { %434 = sbr.rel (%p3291_p10) target bundleno = 833 (0x341), region = 64 }
  0x33   : > { %3105 = dma.done.wait (%p3299_p13), [#allocation3], 16  }
  0x34   : > { %3107 = vsyncadd (%p3299_p13), [#allocation3], 4294967280 }
  0x35   : > { %3109 = dma.done.wait (%p3299_p13), [#allocation6], 528  }
  0x36   : > { %3111 = vsyncadd (%p3299_p13), [#allocation6], 4294966768 }
  0x37   : > { %3113 = dma.done.wait (%p3299_p13), [#allocation9], 16384  }
  0x38   : > { %3115 = vsyncadd (%p3299_p13), [#allocation9], 4294950912  ;;  %s2007_s30 = sshll.u32 %s3134_s20, 1  ;;  %p504_p1 = scmp.lt.s32.totalorder %s3138_s21, 1  ;;  %v3163_v0 = vmov 1   ;;  %v3164_v1 = vmov 0  }
  0x39   : > { %2889 = vset.pattern.permute.xlu1 %v3163_v0  ;;  %2888 = vset.pattern.permute.xlu0 %v3164_v1  ;;  %p506_p2 = scmp.lt.s32.totalorder %s2007_s30, 7  ;;  %s498_s12 = sand.u32 1, %s3126_s18   ;;  %v3165_v2 = vmov 2   ;;  %v2611_v5 = vld [vmem:[#allocation5 + $0x18] sm:$0xff]  ;;  %v2610_v6 = vld [vmem:[#allocation5 + $0x10] sm:$0xff]  ;;  %v2609_v7 = vld [vmem:[#allocation5 + $0x8] sm:$0xff] }
  0x3a   : > { %s505_s13 = scalar_select %p504_p1, %s3138_s21, 1  ;;  %2890 = vset.pattern.permute.xlu2 %v3165_v2  ;;  %611 = vmatpush.bf16.msra.mxu0 %v2611_v5  ;;  %v2608_v8 = vld [vmem:[#allocation5] sm:$0xff]  ;;  %v2085_v9 = vld [vmem:[%s3533_s5 + $0x70] sm:$0xf]  ;;  %v2627_v10 = vld [vmem:[%s3533_s5 + $0x74] sm:$0xf0] }
  0x3b   : > { %s3586_s30 = smov (!%p506_p2, %s2007_s30), 7  ;;  %s3357_s15 = sshll.u32 %s498_s12, 1  ;;  %v2626_v11 = vld [vmem:[%s3533_s5 + $0x74] sm:$0xf]  ;;  %v2086_v12 = vor.u32 %v2627_v10, %v2085_v9  ;;  %v2087_v13 = vld [vmem:[%s3533_s5 + $0x78] sm:$0xf0] }
  0x3c   : > { %s2008_s27 = sshll.u32 %s505_s13, 3  ;;  %v2077_v14 = vld [vmem:[%s3533_s5 + $0x60] sm:$0xf]  ;;  %v2625_v15 = vld [vmem:[%s3533_s5 + $0x64] sm:$0xf0]  ;;  %v2090_v16 = vor.u32 %v2626_v11, %v2087_v13  ;;  %vm603_vm0 = vcmask 523264  }
  0x3d   : > { %s509_s28 = sadd.s32 %s2008_s27, %s3586_s30  ;;  %v2624_v17 = vld [vmem:[%s3533_s5 + $0x64] sm:$0xf]  ;;  %v2079_v18 = vld [vmem:[%s3533_s5 + $0x68] sm:$0xf0]  ;;  %730 = vmatpush.bf16.msra.mxu1 %v2086_v12  ;;  %v2078_v19 = vor.u32 %v2625_v15, %v2077_v14  ;;  %v2069_v21 = vld [vmem:[%s3533_s5 + $0x50] sm:$0xf] }
  0x3e   : > { %s2009_s25 = sshll.u32 %s509_s28, 3  ;;  %612 = vmatpush.bf16.msra.mxu0 %v2610_v6  ;;  %744 = vmatpush.bf16.msra.mxu2 %v2090_v16  ;;  %v2082_v20 = vor.u32 %v2624_v17, %v2079_v18  ;;  %v2623_v22 = vld [vmem:[%s3533_s5 + $0x54] sm:$0xf0]  ;;  %v518_v23 = vld [vmem:[%s3529_s1] sm:$0x7]  ;;  %s3477_s16 = scalar_lea.vmem [#allocation11], %s3357_s15 }
  0x3f   : > { %s511_s26 = scalar_lea.vmem %s3528_s0, %s2009_s25  ;;  %v2622_v24 = vld [vmem:[%s3533_s5 + $0x54] sm:$0xf]  ;;  %v2071_v25 = vld [vmem:[%s3533_s5 + $0x58] sm:$0xf0]  ;;  %v2070_v26 = vor.u32 %v2623_v22, %v2069_v21  ;;  %v540_v28 = vperm.slane %v518_v23, 1  ;;  %v529_v29 = vperm.slane %v518_v23, 0 }
  0x40   : > { %v516_v3 = vld [vmem:[%s511_s26] sm:$0xff]  ;;  %v517_v4 = vld [vmem:[%s511_s26 + $0x8] sm:$0xff]  ;;  %v2074_v30 = vor.u32 %v2622_v24, %v2071_v25  ;;  %v553_v38 = vperm.slane %v518_v23, 2  ;;  %v2053_v59 = vld [vmem:[%s3533_s5 + $0x30] sm:$0xf]  ;;  %p2603_p4 = scmp.ne.s32.totalorder %s3134_s20, 0 }
  0x41   : > { %533 = vperm.xlu1 %2889, %v516_v3   ;;  %521 = vperm.xlu0 %2888, %v516_v3   ;;  %v2061_v31 = vld [vmem:[%s3533_s5 + $0x40] sm:$0xf]  ;;  %v2621_v32 = vld [vmem:[%s3533_s5 + $0x44] sm:$0xf0]  ;;  %v2620_v33 = vld [vmem:[%s3533_s5 + $0x44] sm:$0xf] }
  0x42   : > { %546 = vperm.xlu2 %2890, %v516_v3   ;;  %613 = vmatpush.bf16.msra.mxu0 %v2609_v7  ;;  %v2063_v34 = vld [vmem:[%s3533_s5 + $0x48] sm:$0xf0]  ;;  %v2062_v37 = vor.u32 %v2621_v32, %v2061_v31  ;;  %v2892_v50 = vld [vmem:[#allocation2] ss:$0 sm:$0xff]  ;;  %v2619_v60 = vld [vmem:[%s3533_s5 + $0x34] sm:$0xf0] }
  0x43   : > { %731 = vmatpush.bf16.msra.mxu1 %v2078_v19  ;;  %745 = vmatpush.bf16.msra.mxu2 %v2082_v20  ;;  %v2066_v41 = vor.u32 %v2620_v33, %v2063_v34  ;;  %v2618_v61 = vld [vmem:[%s3533_s5 + $0x34] sm:$0xf]  ;;  %v2054_v62 = vor.u32 %v2619_v60, %v2053_v59  ;;  %v2055_v63 = vld [vmem:[%s3533_s5 + $0x38] sm:$0xf0]  ;;  %v2045_v1 = vld [vmem:[%s3533_s5 + $0x20] sm:$0xf] }
  0x44   : > { %v2058_v0 = vor.u32 %v2618_v61, %v2055_v63  ;;  %v2616_v3 = vld [vmem:[%s3533_s5 + $0x24] sm:$0xf]  ;;  %v2047_v5 = vld [vmem:[%s3533_s5 + $0x28] sm:$0xf0]  ;;  %v2037_v7 = vld [vmem:[%s3533_s5 + $0x10] sm:$0xf] }
  0x45   : > { %v2050_v6 = vor.u32 %v2616_v3, %v2047_v5  ;;  %v2614_v9 = vld [vmem:[%s3533_s5 + $0x14] sm:$0xf]  ;;  %v2039_v11 = vld [vmem:[%s3533_s5 + $0x18] sm:$0xf0]  ;;  %v2029_v13 = vld [vmem:[%s3533_s5] sm:$0xf] }
  0x46   : > { %614 = vmatpush.bf16.msra.mxu0 %v2608_v8  ;;  %v2615_v8 = vld [vmem:[%s3533_s5 + $0x14] sm:$0xf0]  ;;  %v2042_v12 = vor.u32 %v2614_v9, %v2039_v11  ;;  %v2613_v14 = vld [vmem:[%s3533_s5 + $0x4] sm:$0xf0]  ;;  %v2612_v15 = vld [vmem:[%s3533_s5 + $0x4] sm:$0xf] }
  0x47   : > { %732 = vmatpush.bf16.msra.mxu1 %v2070_v26  ;;  %746 = vmatpush.bf16.msra.mxu2 %v2074_v30  ;;  %v2038_v10 = vor.u32 %v2615_v8, %v2037_v7  ;;  %v2030_v16 = vor.u32 %v2613_v14, %v2029_v13  ;;  %v2031_v17 = vld [vmem:[%s3533_s5 + $0x8] sm:$0xf0]  ;;  %v2205_v19 = vld [vmem:[#allocation8 + $0xe0] sm:$0xf]  ;;  %v2658_v20 = vld [vmem:[#allocation8 + $0xec] sm:$0xf0] }
  0x48   : > { %v2034_v18 = vor.u32 %v2612_v15, %v2031_v17  ;;  %v2656_v21 = vld [vmem:[#allocation8 + $0xe4] sm:$0xf]  ;;  %v2206_v22 = vor.u32 %v2658_v20, %v2205_v19  ;;  %v2207_v23 = vld [vmem:[#allocation8 + $0xf0] sm:$0xf0]  ;;  %v2189_v24 = vld [vmem:[#allocation8 + $0xc0] sm:$0xf] }
  0x49   : > { %537 = vperm.xlu1 %2889, %v517_v4   ;;  %526 = vperm.xlu0 %2888, %v517_v4   ;;  %v2654_v25 = vld [vmem:[#allocation8 + $0xcc] sm:$0xf0]  ;;  %v2210_v26 = vor.u32 %v2656_v21, %v2207_v23  ;;  %v2688_v32 = vld [vmem:[#allocation8 + $0x1e4] sm:$0xf]  ;;  %v2335_v33 = vld [vmem:[#allocation8 + $0x1f0] sm:$0xf0] }
  0x4a   : > { %550 = vperm.xlu2 %2890, %v517_v4   ;;  %1164 = vmatpush.bf16.msra.mxu3 %v2206_v22  ;;  %v2190_v30 = vor.u32 %v2654_v25, %v2189_v24  ;;  %v2690_v31 = vld [vmem:[#allocation8 + $0x1ec] sm:$0xf0]  ;;  %v2285_v59 = vld [vmem:[#allocation8 + $0x180] sm:$0xf]  ;;  %v2287_v63 = vld [vmem:[#allocation8 + $0x190] sm:$0xf0] }
  0x4b   : > { %733 = vmatpush.bf16.msra.mxu1 %v2062_v37  ;;  %747 = vmatpush.bf16.msra.mxu2 %v2066_v41  ;;  %v2173_v37 = vld [vmem:[#allocation8 + $0xa0] sm:$0xf]  ;;  %v2678_v61 = vld [vmem:[#allocation8 + $0x18c] sm:$0xf0]  ;;  %v2640_v3 = vld [vmem:[#allocation8 + $0x64] sm:$0xf] }
  0x4c   : > { %v2317_v41 = vld [vmem:[#allocation8 + $0x1c0] sm:$0xf]  ;;  %v2286_v5 = vor.u32 %v2678_v61, %v2285_v59  ;;  %v2674_v9 = vld [vmem:[#allocation8 + $0x16c] sm:$0xf0]  ;;  %v2271_v11 = vld [vmem:[#allocation8 + $0x170] sm:$0xf0] }
  0x4d   : > { %v2269_v7 = vld [vmem:[#allocation8 + $0x160] sm:$0xf]  ;;  %v2638_v14 = vld [vmem:[#allocation8 + $0x4c] sm:$0xf0]  ;;  %v2127_v17 = vld [vmem:[#allocation8 + $0x50] sm:$0xf0] }
  0x4e   : > { %1165 = vmatpush.bf16.msra.mxu3 %v2190_v30  ;;  %v2125_v13 = vld [vmem:[#allocation8 + $0x40] sm:$0xf]  ;;  %v2670_v22 = vld [vmem:[#allocation8 + $0x14c] sm:$0xf0]  ;;  %v2668_v23 = vld [vmem:[#allocation8 + $0x144] sm:$0xf] }
  0x4f   : > { %734 = vmatpush.bf16.msra.mxu1 %v2054_v62  ;;  %748 = vmatpush.bf16.msra.mxu2 %v2058_v0  ;;  %v2676_v62 = vld [vmem:[#allocation8 + $0x184] sm:$0xf]  ;;  %v2253_v20 = vld [vmem:[#allocation8 + $0x140] sm:$0xf]  ;;  %v2126_v21 = vor.u32 %v2638_v14, %v2125_v13  ;;  %v2255_v24 = vld [vmem:[#allocation8 + $0x150] sm:$0xf0] }
  0x50   : > { %v2893_v25 = vld [vmem:[#allocation7] ss:$0 sm:$0xff]  ;;  %v2111_v30 = vld [vmem:[#allocation8 + $0x30] sm:$0xf0]  ;;  %v2197_v59 = vld [vmem:[#allocation8 + $0xc8] sm:$0xf] }
  0x51   : > { %2891 = vset.pattern.permute.xlu0 %v3165_v2  ;;  %v2617_v2 = vld [vmem:[%s3533_s5 + $0x24] sm:$0xf0]  ;;  %v2653_v61 = vld [vmem:[#allocation8 + $0xcc] sm:$0xf]  ;;  %v2651_v13 = vld [vmem:[#allocation8 + $0xb4] sm:$0xf0] }
  0x52   : > { %v2046_v4 = vor.u32 %v2617_v2, %v2045_v1  ;;  %v2141_v1 = vld [vmem:[#allocation8 + $0x60] sm:$0xf]  ;;  %v2642_v2 = vld [vmem:[#allocation8 + $0x6c] sm:$0xf0] }
  0x53   : > { %749 = vmatpush.bf16.msra.mxu2 %v2050_v6  ;;  %v2290_v6 = vor.u32 %v2676_v62, %v2287_v63  ;;  %v2142_v8 = vor.u32 %v2642_v2, %v2141_v1  ;;  %v2199_v63 = vld [vmem:[#allocation8 + $0xd8] sm:$0xf0]  ;;  %v2662_v1 = vld [vmem:[#allocation8 + $0x10c] sm:$0xf0] }
  0x54   : > { %735 = vmatpush.bf16.msra.mxu1 %v2046_v4  ;;  %v2143_v4 = vld [vmem:[#allocation8 + $0x70] sm:$0xf0]  ;;  %v2202_v2 = vor.u32 %v2653_v61, %v2199_v63  ;;  %v2117_v61 = vld [vmem:[#allocation8 + $0x28] sm:$0xf]  ;;  %v2633_v63 = vld [vmem:[#allocation8 + $0x2c] sm:$0xf] }
  0x57   : > { %750 = vmatpush.bf16.msra.mxu2 %v2042_v12  ;;  %v2146_v12 = vor.u32 %v2640_v3, %v2143_v4  ;;  %v2660_v4 = vld [vmem:[#allocation8 + $0x104] sm:$0xf] }
  0x58   : > { %736 = vmatpush.bf16.msra.mxu1 %v2038_v10  ;;  %v2672_v10 = vld [vmem:[#allocation8 + $0x164] sm:$0xf] }
  0x59   : > { %v2274_v19 = vor.u32 %v2672_v10, %v2271_v11  ;;  %v2343_v11 = vld [vmem:[#allocation8 + $0x1f8] sm:$0xf0] }
  0x5b   : > { %751 = vmatpush.bf16.msra.mxu2 %v2034_v18  ;;  %v2270_v18 = vor.u32 %v2674_v9, %v2269_v7  ;;  %v2341_v7 = vld [vmem:[#allocation8 + $0x1e8] sm:$0xf]  ;;  %v2689_v9 = vld [vmem:[#allocation8 + $0x1ec] sm:$0xf] }
  0x5c   : > { %737 = vmatpush.bf16.msra.mxu1 %v2030_v16  ;;  %v2636_v16 = vld [vmem:[#allocation8 + $0x44] sm:$0xf]  ;;  %v2346_v14 = vor.u32 %v2689_v9, %v2343_v11  ;;  %v2629_v11 = vld [vmem:[#allocation8 + $0xc] sm:$0xf] }
  0x60   : > { %1192 = vmatpush.bf16.msrb.mxu1 %v2210_v26  ;;  %v2130_v26 = vor.u32 %v2636_v16, %v2127_v17  ;;  %v2649_v16 = vld [vmem:[#allocation8 + $0xac] sm:$0xf]  ;;  %v2183_v17 = vld [vmem:[#allocation8 + $0xb8] sm:$0xf0] }
  0x9c   : > { %v547_v27 = vpop.permute.xlu2 %546 }
  0x9d   : > { %v554_v42 = vmul.f32 %v553_v38, %v547_v27  ;;  %v2652_v27 = vld [vmem:[#allocation8 + $0xc4] sm:$0xf] }
  0xa4   : > { %v551_v44 = vpop.permute.xlu2 %550 }
  0xa5   : > { %v555_v51 = vmul.f32 %v553_v38, %v551_v44  ;;  %v2650_v38 = vld [vmem:[#allocation8 + $0xac] sm:$0xf0]  ;;  %v2684_v44 = vld [vmem:[#allocation8 + $0x1c4] sm:$0xf] }
  0xb3   : > { %v534_v35 = vpop.permute.xlu1 %533  ;;  %v522_v36 = vpop.permute.xlu0 %521 }
  0xb4   : > { %v541_v39 = vmul.f32 %v540_v28, %v534_v35  ;;  %v530_v40 = vmul.f32 %v529_v29, %v522_v36  ;;  %v2338_v36 = vor.u32 %v2688_v32, %v2335_v33  ;;  %v2258_v32 = vor.u32 %v2668_v23, %v2255_v24  ;;  %v2327_v23 = vld [vmem:[#allocation8 + $0x1d8] sm:$0xf0] }
  0xb6   : > { %v543_v43 = vadd.f32 %v541_v39, %v530_v40  ;;  %v2648_v39 = vld [vmem:[#allocation8 + $0xa4] sm:$0xf]  ;;  %v2175_v40 = vld [vmem:[#allocation8 + $0xb0] sm:$0xf0]  ;;  %1206 = vmatpush.bf16.msrb.mxu2 %v2338_v36  ;;  %v2093_v36 = vld [vmem:[#allocation8] sm:$0xf] }
  0xb8   : > { %v556_v47 = vadd.f32 %v554_v42, %v543_v43  ;;  %v2686_v42 = vld [vmem:[#allocation8 + $0x1cc] sm:$0xf0] }
  0xb9   : > { %v2318_v43 = vor.u32 %v2686_v42, %v2317_v41  ;;  %v2095_v41 = vld [vmem:[#allocation8 + $0x10] sm:$0xf0] }
  0xba   : > { %v562_v54 = vadd.f32 %v2892_v50, %v556_v47 }
  0xbb   : > { %v538_v45 = vpop.permute.xlu1 %537  ;;  %v527_v46 = vpop.permute.xlu0 %526 }
  0xbc   : > { %v542_v48 = vmul.f32 %v540_v28, %v538_v45  ;;  %v531_v49 = vmul.f32 %v529_v29, %v527_v46  ;;  %v564_v56 = vmax.f32 %v562_v54, 0.0  ;;  %v2191_v28 = vld [vmem:[#allocation8 + $0xd0] sm:$0xf0]  ;;  %v2333_v29 = vld [vmem:[#allocation8 + $0x1e0] sm:$0xf]  ;;  %v2174_v46 = vor.u32 %v2650_v38, %v2173_v37 }
  0xbd   : > { %v2194_v34 = vor.u32 %v2652_v27, %v2191_v28  ;;  %v2334_v35 = vor.u32 %v2690_v31, %v2333_v29  ;;  %v2319_v45 = vld [vmem:[#allocation8 + $0x1d0] sm:$0xf0]  ;;  %v2644_v54 = vld [vmem:[#allocation8 + $0x84] sm:$0xf]  ;;  %v2109_v27 = vld [vmem:[#allocation8 + $0x20] sm:$0xf]  ;;  %v2254_v31 = vor.u32 %v2670_v22, %v2253_v20 }
  0xbe   : > { %v544_v52 = vadd.f32 %v542_v48, %v531_v49  ;;  %v2322_v47 = vor.u32 %v2684_v44, %v2319_v45  ;;  %v2157_v48 = vld [vmem:[#allocation8 + $0x80] sm:$0xf]  ;;  %v2646_v49 = vld [vmem:[#allocation8 + $0x8c] sm:$0xf0]  ;;  %1166 = vmatpush.bf16.msra.mxu3 %v2174_v46  ;;  %v2632_v29 = vld [vmem:[#allocation8 + $0x24] sm:$0xf] }
  0xbf   : > { %1178 = vmatpush.bf16.msrb.mxu0 %v2334_v35  ;;  %1193 = vmatpush.bf16.msrb.mxu1 %v2194_v34  ;;  %v2158_v60 = vor.u32 %v2646_v49, %v2157_v48  ;;  %v2634_v28 = vld [vmem:[#allocation8 + $0x2c] sm:$0xf0]  ;;  %v2114_v35 = vor.u32 %v2632_v29, %v2111_v30  ;;  %v2659_v48 = vld [vmem:[#allocation8 + $0xf4] sm:$0xf0]  ;;  %v2657_v49 = vld [vmem:[#allocation8 + $0xec] sm:$0xf] }
  0xc0   : > { %v557_v53 = vadd.f32 %v555_v51, %v544_v52  ;;  %v2301_v51 = vld [vmem:[#allocation8 + $0x1a0] sm:$0xf]  ;;  %v2682_v52 = vld [vmem:[#allocation8 + $0x1ac] sm:$0xf0]  ;;  %1207 = vmatpush.bf16.msrb.mxu2 %v2322_v47  ;;  %v2110_v33 = vor.u32 %v2634_v28, %v2109_v27  ;;  %v2213_v47 = vld [vmem:[#allocation8 + $0xe8] sm:$0xf] }
  0xc1   : > { %v2630_v37 = vld [vmem:[#allocation8 + $0xc] sm:$0xf0]  ;;  %v2687_v20 = vld [vmem:[#allocation8 + $0x1d4] sm:$0xf0]  ;;  %v2645_v27 = vld [vmem:[#allocation8 + $0x8c] sm:$0xf] }
  0xc2   : > { %v563_v55 = vadd.f32 %v2892_v50, %v557_v53  ;;  %v2178_v50 = vor.u32 %v2648_v39, %v2175_v40  ;;  %v2680_v53 = vld [vmem:[#allocation8 + $0x1a4] sm:$0xf]  ;;  %1167 = vmatpush.bf16.msra.mxu3 %v2158_v60  ;;  %v2094_v42 = vor.u32 %v2630_v37, %v2093_v36  ;;  %v2655_v60 = vld [vmem:[#allocation8 + $0xd4] sm:$0xf0]  ;;  %v2167_v29 = vld [vmem:[#allocation8 + $0x98] sm:$0xf0] }
  0xc3   : > { %1179 = vmatpush.bf16.msrb.mxu0 %v2318_v43  ;;  %v2628_v40 = vld [vmem:[#allocation8 + $0x4] sm:$0xf]  ;;  %v2198_v62 = vor.u32 %v2655_v60, %v2197_v59  ;;  %v2170_v30 = vor.u32 %v2645_v27, %v2167_v29  ;;  %v2149_v37 = vld [vmem:[#allocation8 + $0x68] sm:$0xf]  ;;  %v2279_v59 = vld [vmem:[#allocation8 + $0x178] sm:$0xf0] }
  0xc4   : > { %v565_v57 = vmax.f32 %v563_v55, 0.0  ;;  %v2159_v55 = vld [vmem:[#allocation8 + $0x90] sm:$0xf0]  ;;  %1194 = vmatpush.bf16.msrb.mxu1 %v2178_v50  ;;  %v2098_v45 = vor.u32 %v2628_v40, %v2095_v41  ;;  %v2214_v50 = vor.u32 %v2659_v48, %v2213_v47  ;;  %v2151_v41 = vld [vmem:[#allocation8 + $0x78] sm:$0xf0] }
  0xc5   : > { %v2162_v0 = vor.u32 %v2644_v54, %v2159_v55  ;;  %v2295_v47 = vld [vmem:[#allocation8 + $0x198] sm:$0xf0] }
  0xc6   : > { %v566_v58 = vpack.c.bf16 %v565_v57, %v564_v56  ;;  %v2303_v56 = vld [vmem:[#allocation8 + $0x1b0] sm:$0xf0]  ;;  %v2302_v57 = vor.u32 %v2682_v52, %v2301_v51  ;;  %1168 = vmatpush.bf16.msra.mxu3 %v2142_v8  ;;  %v2215_v51 = vld [vmem:[#allocation8 + $0xf8] sm:$0xf0]  ;;  %v2237_v52 = vld [vmem:[#allocation8 + $0x120] sm:$0xf] }
  0xc7   : > { %v2218_v54 = vor.u32 %v2657_v49, %v2215_v51  ;;  %v2691_v8 = vld [vmem:[#allocation8 + $0x1f4] sm:$0xf0]  ;;  %v2133_v49 = vld [vmem:[#allocation8 + $0x48] sm:$0xf]  ;;  %v2637_v51 = vld [vmem:[#allocation8 + $0x4c] sm:$0xf] }
  0xc8   : > { %2026 = vmatmul.msk.bf16.vlgmr.msra.gmra.mxu0 %vm603_vm0, %v566_v58  ;;  %v2306_v58 = vor.u32 %v2680_v53, %v2303_v56  ;;  %1195 = vmatpush.bf16.msrb.mxu1 %v2162_v0  ;;  %v2666_v53 = vld [vmem:[#allocation8 + $0x12c] sm:$0xf0]  ;;  %v2664_v56 = vld [vmem:[#allocation8 + $0x124] sm:$0xf]  ;;  %v2221_v0 = vld [vmem:[#allocation8 + $0x100] sm:$0xf]  ;;  %v2342_v10 = vor.u32 %v2691_v8, %v2341_v7 }
  0xc9   : > { %1180 = vmatpush.bf16.msrb.mxu0 %v2302_v57  ;;  %v2238_v55 = vor.u32 %v2666_v53, %v2237_v52  ;;  %v2239_v57 = vld [vmem:[#allocation8 + $0x130] sm:$0xf0]  ;;  %v2222_v3 = vor.u32 %v2662_v1, %v2221_v0  ;;  %v2135_v53 = vld [vmem:[#allocation8 + $0x58] sm:$0xf0]  ;;  %v2101_v8 = vld [vmem:[#allocation8 + $0x8] sm:$0xf] }
  0xca   : > { %1208 = vmatpush.bf16.msrb.mxu2 %v2306_v58  ;;  %1169 = vmatpush.bf16.msra.mxu3 %v2126_v21  ;;  %v2242_v58 = vor.u32 %v2664_v56, %v2239_v57  ;;  %v2685_v21 = vld [vmem:[#allocation8 + $0x1cc] sm:$0xf]  ;;  %v2675_v56 = vld [vmem:[#allocation8 + $0x174] sm:$0xf0]  ;;  %v2119_v1 = vld [vmem:[#allocation8 + $0x38] sm:$0xf0] }
  0xcb   : > { %v2330_v24 = vor.u32 %v2685_v21, %v2327_v23  ;;  %v2673_v57 = vld [vmem:[#allocation8 + $0x16c] sm:$0xf]  ;;  %v2263_v7 = vld [vmem:[#allocation8 + $0x158] sm:$0xf0]  ;;  %v2229_v21 = vld [vmem:[#allocation8 + $0x108] sm:$0xf] }
  0xcc   : > { %1196 = vmatpush.bf16.msrb.mxu1 %v2146_v12  ;;  %v2181_v12 = vld [vmem:[#allocation8 + $0xa8] sm:$0xf]  ;;  %v2282_v60 = vor.u32 %v2673_v57, %v2279_v59  ;;  %v2661_v23 = vld [vmem:[#allocation8 + $0x10c] sm:$0xf]  ;;  %v2231_v27 = vld [vmem:[#allocation8 + $0x118] sm:$0xf0] }
  0xcd   : > { %1181 = vmatpush.bf16.msrb.mxu0 %v2286_v5  ;;  %v2223_v5 = vld [vmem:[#allocation8 + $0x110] sm:$0xf0]  ;;  %v2389_v59 = vld [vmem:[#allocation10 + $0x50] sm:$0xf] }
  0xce   : > { %1209 = vmatpush.bf16.msrb.mxu2 %v2290_v6  ;;  %1170 = vmatpush.bf16.msra.mxu3 %v2110_v33  ;;  %v2226_v6 = vor.u32 %v2660_v4, %v2223_v5  ;;  %v2681_v33 = vld [vmem:[#allocation8 + $0x1ac] sm:$0xf]  ;;  %v2122_v4 = vor.u32 %v2633_v63, %v2119_v1  ;;  %v2721_v1 = vld [vmem:[#allocation10 + $0xe4] sm:$0xf0] }
  0xd0   : > { %1197 = vmatpush.bf16.msrb.mxu1 %v2130_v26  ;;  %v2647_v26 = vld [vmem:[#allocation8 + $0x94] sm:$0xf0] }
  0xd1   : > { %1182 = vmatpush.bf16.msrb.mxu0 %v2270_v18  ;;  %v2186_v18 = vor.u32 %v2649_v16, %v2183_v17  ;;  %v2667_v16 = vld [vmem:[#allocation8 + $0x134] sm:$0xf0]  ;;  %v2665_v17 = vld [vmem:[#allocation8 + $0x12c] sm:$0xf] }
  0xd2   : > { %1210 = vmatpush.bf16.msrb.mxu2 %v2274_v19  ;;  %1171 = vmatpush.bf16.msra.mxu3 %v2094_v42  ;;  %v2325_v19 = vld [vmem:[#allocation8 + $0x1c8] sm:$0xf] }
  0xd3   : > { %v2326_v22 = vor.u32 %v2687_v20, %v2325_v19 }
  0xd4   : > { %1198 = vmatpush.bf16.msrb.mxu1 %v2114_v35  ;;  %v2311_v35 = vld [vmem:[#allocation8 + $0x1b8] sm:$0xf0] }
  0xd5   : > { %1183 = vmatpush.bf16.msrb.mxu0 %v2254_v31  ;;  %v2309_v31 = vld [vmem:[#allocation8 + $0x1a8] sm:$0xf]  ;;  %v2314_v36 = vor.u32 %v2681_v33, %v2311_v35  ;;  %v2405_v35 = vld [vmem:[#allocation10 + $0x70] sm:$0xf] }
  0xd6   : > { %1211 = vmatpush.bf16.msrb.mxu2 %v2258_v32  ;;  %1220 = vmatpush.bf16.msrb.mxu3 %v2214_v50  ;;  %v2683_v32 = vld [vmem:[#allocation8 + $0x1b4] sm:$0xf0] }
  0xd7   : > { %v2639_v50 = vld [vmem:[#allocation8 + $0x54] sm:$0xf0] }
  0xd8   : > { %1199 = vmatpush.bf16.msrb.mxu1 %v2098_v45  ;;  %v2677_v45 = vld [vmem:[#allocation8 + $0x18c] sm:$0xf]  ;;  %v2134_v52 = vor.u32 %v2639_v50, %v2133_v49  ;;  %v2469_v49 = vld [vmem:[#allocation10 + $0xf0] sm:$0xf]  ;;  %v2737_v50 = vld [vmem:[#allocation10 + $0x164] sm:$0xf0] }
  0xd9   : > { %1184 = vmatpush.bf16.msrb.mxu0 %v2238_v55  ;;  %v2298_v48 = vor.u32 %v2677_v45, %v2295_v47  ;;  %v2277_v55 = vld [vmem:[#allocation8 + $0x168] sm:$0xf]  ;;  %v2525_v47 = vld [vmem:[#allocation10 + $0x160] sm:$0xf] }
  0xda   : > { %1212 = vmatpush.bf16.msrb.mxu2 %v2242_v58  ;;  %1221 = vmatpush.bf16.msrb.mxu3 %v2198_v62  ;;  %v2278_v58 = vor.u32 %v2675_v56, %v2277_v55  ;;  %v2635_v62 = vld [vmem:[#allocation8 + $0x34] sm:$0xf0]  ;;  %v2705_v45 = vld [vmem:[#allocation10 + $0x64] sm:$0xf0]  ;;  %v2526_v56 = vor.u32 %v2737_v50, %v2525_v47  ;;  %v2407_v47 = vld [vmem:[#allocation10 + $0x78] sm:$0xf0] }
  0xdb   : > { %v2118_v0 = vor.u32 %v2635_v62, %v2117_v61  ;;  %v2709_v50 = vld [vmem:[#allocation10 + $0x84] sm:$0xf0] }
  0xdd   : > { %1185 = vmatpush.bf16.msrb.mxu0 %v2222_v3  ;;  %v2671_v3 = vld [vmem:[#allocation8 + $0x154] sm:$0xf0] }
  0xde   : > { %1213 = vmatpush.bf16.msrb.mxu2 %v2226_v6  ;;  %v2669_v6 = vld [vmem:[#allocation8 + $0x14c] sm:$0xf] }
  0xdf   : > { %v2266_v9 = vor.u32 %v2669_v6, %v2263_v7  ;;  %v2453_v6 = vld [vmem:[#allocation10 + $0xd0] sm:$0xf]  ;;  %v2719_v7 = vld [vmem:[#allocation10 + $0xd4] sm:$0xf0] }
  0xe1   : > { %1234 = vmatpush.bf16.msra.mxu0 %v2342_v10  ;;  %v2631_v10 = vld [vmem:[#allocation8 + $0x14] sm:$0xf0] }
  0xe5   : > { %1235 = vmatpush.bf16.msra.mxu0 %v2326_v22  ;;  %v2663_v22 = vld [vmem:[#allocation8 + $0x114] sm:$0xf0] }
 0x145   : > { %v616_v15 = vpop.f32.mrf.mxu0 }
 0x146   : > { %v617_v34 = vadd.f32 %v2893_v25, %v616_v15  ;;  %v2182_v15 = vor.u32 %v2651_v13, %v2181_v12  ;;  %v2103_v12 = vld [vmem:[#allocation8 + $0x18] sm:$0xf0]  ;;  %v2102_v13 = vor.u32 %v2631_v10, %v2101_v8  ;;  %v2699_v10 = vld [vmem:[#allocation10 + $0x34] sm:$0xf0] }
 0x148   : > { %v625_v43 = vmax.f32 %v617_v34, 0.0  ;;  %1222 = vmatpush.bf16.msrb.mxu3 %v2182_v15  ;;  %v2310_v34 = vor.u32 %v2683_v32, %v2309_v31  ;;  %v2245_v15 = vld [vmem:[#allocation8 + $0x128] sm:$0xf] }
 0x149   : > { %v2246_v19 = vor.u32 %v2667_v16, %v2245_v15  ;;  %v2365_v15 = vld [vmem:[#allocation10 + $0x20] sm:$0xf]  ;;  %v2697_v16 = vld [vmem:[#allocation10 + $0x24] sm:$0xf0] }
 0x14a   : > { %1236 = vmatpush.bf16.msra.mxu0 %v2310_v34 }
 0x14d   : > { %v618_v38 = vpop.f32.mrf.mxu0 }
 0x14e   : > { %v619_v39 = vadd.f32 %v2893_v25, %v618_v38  ;;  %v2165_v25 = vld [vmem:[#allocation8 + $0x88] sm:$0xf]  ;;  %v2643_v38 = vld [vmem:[#allocation8 + $0x74] sm:$0xf0] }
 0x14f   : > { %v2166_v28 = vor.u32 %v2647_v26, %v2165_v25  ;;  %v2150_v40 = vor.u32 %v2643_v38, %v2149_v37  ;;  %v2230_v26 = vor.u32 %v2663_v22, %v2229_v21  ;;  %v2357_v22 = vld [vmem:[#allocation10 + $0x10] sm:$0xf] }
 0x150   : > { %v626_v44 = vmax.f32 %v619_v39, 0.0  ;;  %v2641_v39 = vld [vmem:[#allocation8 + $0x6c] sm:$0xf] }
 0x151   : > { %1223 = vmatpush.bf16.msrb.mxu3 %v2166_v28  ;;  %v2154_v42 = vor.u32 %v2641_v39, %v2151_v41  ;;  %v2234_v28 = vor.u32 %v2661_v23, %v2231_v27  ;;  %v2533_v39 = vld [vmem:[#allocation10 + $0x170] sm:$0xf]  ;;  %v2739_v41 = vld [vmem:[#allocation10 + $0x174] sm:$0xf0] }
 0x152   : > { %v627_v46 = vpack.c.bf16 %v626_v44, %v625_v43  ;;  %v2293_v43 = vld [vmem:[#allocation8 + $0x188] sm:$0xf]  ;;  %v2679_v44 = vld [vmem:[#allocation8 + $0x194] sm:$0xf0]  ;;  %v2517_v27 = vld [vmem:[#allocation10 + $0x150] sm:$0xf] }
 0x153   : > { %v2695_v23 = vld [vmem:[#allocation10 + $0x14] sm:$0xf0] }
 0x154   : > { %738 = vmatmul.bf16.vlgmr.msra.gmra.mxu1 %v627_v46  ;;  %752 = vmatmul.bf16.vlgmr.msra.gmra.mxu2 %v627_v46  ;;  %v2294_v46 = vor.u32 %v2679_v44, %v2293_v43  ;;  %v2397_v44 = vld [vmem:[#allocation10 + $0x60] sm:$0xf] }
 0x155   : > { %1248 = vmatpush.bf16.msra.mxu1 %v2218_v54  ;;  %1262 = vmatpush.bf16.msra.mxu2 %v2346_v14  ;;  %v2138_v54 = vor.u32 %v2637_v51, %v2135_v53  ;;  %v2106_v14 = vor.u32 %v2629_v11, %v2103_v12  ;;  %v2597_v53 = vld [vmem:[#allocation10 + $0x1f0] sm:$0xf]  ;;  %v2398_v55 = vor.u32 %v2705_v45, %v2397_v44  ;;  %v2445_v12 = vld [vmem:[#allocation10 + $0xc0] sm:$0xf]  ;;  %v2751_v44 = vld [vmem:[#allocation10 + $0x1d4] sm:$0xf0] }
 0x156   : > { %1224 = vmatpush.bf16.msrb.mxu3 %v2150_v40  ;;  %1237 = vmatpush.bf16.msra.mxu0 %v2294_v46  ;;  %v2534_v46 = vor.u32 %v2739_v41, %v2533_v39  ;;  %v2454_v11 = vor.u32 %v2719_v7, %v2453_v6  ;;  %v2509_v39 = vld [vmem:[#allocation10 + $0x140] sm:$0xf]  ;;  %v2706_v45 = vld [vmem:[#allocation10 + $0x74] sm:$0xf]  ;;  %v2391_v6 = vld [vmem:[#allocation10 + $0x58] sm:$0xf0] }
 0x159   : > { %1249 = vmatpush.bf16.msra.mxu1 %v2202_v2  ;;  %1263 = vmatpush.bf16.msra.mxu2 %v2330_v24  ;;  %v2261_v2 = vld [vmem:[#allocation8 + $0x148] sm:$0xf]  ;;  %v644_v24 = vld [vmem:[%s3534_s6] sm:$0x3] }
 0x15a   : > { %1225 = vmatpush.bf16.msrb.mxu3 %v2134_v52  ;;  %1238 = vmatpush.bf16.msra.mxu0 %v2278_v58  ;;  %v2262_v5 = vor.u32 %v2671_v3, %v2261_v2  ;;  %v646_v29 = vperm.slane %v644_v24, 0  ;;  %v647_v33 = vperm.slane %v644_v24, 1  ;;  %v2723_v52 = vld [vmem:[#allocation10 + $0xf4] sm:$0xf0]  ;;  %v2381_v3 = vld [vmem:[#allocation10 + $0x40] sm:$0xf] }
 0x15b   : > { %v2470_v61 = vor.u32 %v2723_v52, %v2469_v49  ;;  %v2429_v24 = vld [vmem:[#allocation10 + $0xa0] sm:$0xf] }
 0x15c   : > { %v2413_v49 = vld [vmem:[#allocation10 + $0x80] sm:$0xf] }
 0x15d   : > { %1250 = vmatpush.bf16.msra.mxu1 %v2186_v18  ;;  %1264 = vmatpush.bf16.msra.mxu2 %v2314_v36  ;;  %v2247_v18 = vld [vmem:[#allocation8 + $0x138] sm:$0xf0]  ;;  %v2707_v36 = vld [vmem:[#allocation10 + $0x74] sm:$0xf0]  ;;  %v2414_v52 = vor.u32 %v2709_v50, %v2413_v49 }
 0x15e   : > { %1226 = vmatpush.bf16.msrb.mxu3 %v2118_v0  ;;  %1239 = vmatpush.bf16.msra.mxu0 %v2262_v5  ;;  %v2250_v20 = vor.u32 %v2665_v17, %v2247_v18  ;;  %v2406_v40 = vor.u32 %v2707_v36, %v2405_v35  ;;  %v2461_v0 = vld [vmem:[#allocation10 + $0xe0] sm:$0xf]  ;;  %v2437_v18 = vld [vmem:[#allocation10 + $0xb0] sm:$0xf]  ;;  %v2693_v35 = vld [vmem:[#allocation10 + $0x4] sm:$0xf0] }
 0x15f   : > { %v2462_v5 = vor.u32 %v2721_v1, %v2461_v0  ;;  %v2421_v36 = vld [vmem:[#allocation10 + $0x90] sm:$0xf]  ;;  %v2493_v0 = vld [vmem:[#allocation10 + $0x120] sm:$0xf]  ;;  %v2729_v1 = vld [vmem:[#allocation10 + $0x124] sm:$0xf0] }
 0x161   : > { %1251 = vmatpush.bf16.msra.mxu1 %v2170_v30  ;;  %1265 = vmatpush.bf16.msra.mxu2 %v2298_v48 }
 0x162   : > { %1227 = vmatpush.bf16.msrb.mxu3 %v2102_v13  ;;  %1240 = vmatpush.bf16.msra.mxu0 %v2246_v19  ;;  %v2717_v13 = vld [vmem:[#allocation10 + $0xc4] sm:$0xf0]  ;;  %v2715_v19 = vld [vmem:[#allocation10 + $0xb4] sm:$0xf0] }
 0x163   : > { %v2446_v17 = vor.u32 %v2717_v13, %v2445_v12  ;;  %v2438_v21 = vor.u32 %v2715_v19, %v2437_v18  ;;  %v2485_v12 = vld [vmem:[#allocation10 + $0x110] sm:$0xf]  ;;  %v2727_v13 = vld [vmem:[#allocation10 + $0x114] sm:$0xf0]  ;;  %v2383_v18 = vld [vmem:[#allocation10 + $0x48] sm:$0xf0] }
 0x165   : > { %1252 = vmatpush.bf16.msra.mxu1 %v2154_v42  ;;  %1266 = vmatpush.bf16.msra.mxu2 %v2282_v60  ;;  %v2703_v60 = vld [vmem:[#allocation10 + $0x54] sm:$0xf0] }
 0x166   : > { %1241 = vmatpush.bf16.msra.mxu0 %v2230_v26  ;;  %v2390_v2 = vor.u32 %v2703_v60, %v2389_v59  ;;  %v2713_v26 = vld [vmem:[#allocation10 + $0xa4] sm:$0xf0]  ;;  %v2399_v59 = vld [vmem:[#allocation10 + $0x68] sm:$0xf0]  ;;  %v2722_v60 = vld [vmem:[#allocation10 + $0xf4] sm:$0xf] }
 0x169   : > { %1253 = vmatpush.bf16.msra.mxu1 %v2138_v54  ;;  %1267 = vmatpush.bf16.msra.mxu2 %v2266_v9  ;;  %v2755_v54 = vld [vmem:[#allocation10 + $0x1f4] sm:$0xf0]  ;;  %v2373_v9 = vld [vmem:[#allocation10 + $0x30] sm:$0xf] }
 0x16a   : > { %v2598_v62 = vor.u32 %v2755_v54, %v2597_v53  ;;  %v2731_v53 = vld [vmem:[#allocation10 + $0x134] sm:$0xf0]  ;;  %v2573_v54 = vld [vmem:[#allocation10 + $0x1c0] sm:$0xf] }
 0x16d   : > { %1254 = vmatpush.bf16.msra.mxu1 %v2122_v4  ;;  %1268 = vmatpush.bf16.msra.mxu2 %v2250_v20  ;;  %v2701_v4 = vld [vmem:[#allocation10 + $0x44] sm:$0xf0]  ;;  %v2366_v20 = vor.u32 %v2697_v16, %v2365_v15  ;;  %v2486_v15 = vor.u32 %v2727_v13, %v2485_v12  ;;  %v2750_v13 = vld [vmem:[#allocation10 + $0x1d4] sm:$0xf] }
 0x16e   : > { %v2382_v8 = vor.u32 %v2701_v4, %v2381_v3  ;;  %v2494_v3 = vor.u32 %v2729_v1, %v2493_v0  ;;  %v2747_v4 = vld [vmem:[#allocation10 + $0x1b4] sm:$0xf0]  ;;  %v2745_v16 = vld [vmem:[#allocation10 + $0x1a4] sm:$0xf0]  ;;  %v2591_v0 = vld [vmem:[#allocation10 + $0x1e8] sm:$0xf0] }
 0x171   : > { %1255 = vmatpush.bf16.msra.mxu1 %v2106_v14  ;;  %1269 = vmatpush.bf16.msra.mxu2 %v2234_v28  ;;  %v2374_v14 = vor.u32 %v2699_v10, %v2373_v9  ;;  %v2735_v28 = vld [vmem:[#allocation10 + $0x154] sm:$0xf0]  ;;  %v2720_v9 = vld [vmem:[#allocation10 + $0xe4] sm:$0xf]  ;;  %v2463_v10 = vld [vmem:[#allocation10 + $0xe8] sm:$0xf0] }
 0x1d1   : > { %v739_v25 = vpop.f32.mrf.mxu1 }
 0x1d2   : > { %v740_v31 = vadd.f32 %v739_v25, %v646_v29  ;;  %v2358_v25 = vor.u32 %v2695_v23, %v2357_v22  ;;  %v2455_v22 = vld [vmem:[#allocation10 + $0xd8] sm:$0xf0] }
 0x1d4   : > { %v764_v37 = vmax.f32 %v740_v31, 0.0  ;;  %v2589_v31 = vld [vmem:[#allocation10 + $0x1e0] sm:$0xf] }
 0x1d7   : > { %v753_v30 = vpop.f32.mrf.mxu2 }
 0x1d8   : > { %v754_v42 = vadd.f32 %v753_v30, %v647_v33  ;;  %v2518_v30 = vor.u32 %v2735_v28, %v2517_v27  ;;  %v2743_v28 = vld [vmem:[#allocation10 + $0x194] sm:$0xf0] }
 0x1d9   : > { %v741_v32 = vpop.f32.mrf.mxu1 }
 0x1da   : > { %v742_v34 = vadd.f32 %v741_v32, %v646_v29  ;;  %v765_v57 = vmax.f32 %v754_v42, 0.0  ;;  %v2430_v29 = vor.u32 %v2713_v26, %v2429_v24  ;;  %v2753_v32 = vld [vmem:[#allocation10 + $0x1e4] sm:$0xf0]  ;;  %v2477_v24 = vld [vmem:[#allocation10 + $0x100] sm:$0xf] }
 0x1db   : > { %v2549_v26 = vld [vmem:[#allocation10 + $0x190] sm:$0xf] }
 0x1dc   : > { %v766_v38 = vmax.f32 %v742_v34, 0.0  ;;  %v2349_v34 = vld [vmem:[#allocation10] sm:$0xf] }
 0x1de   : > { %v768_v43 = vpack.c.bf16 %v766_v38, %v764_v37  ;;  %v2350_v37 = vor.u32 %v2693_v35, %v2349_v34  ;;  %v2711_v38 = vld [vmem:[#allocation10 + $0x94] sm:$0xf0] }
 0x1df   : > { %v755_v48 = vpop.f32.mrf.mxu2  ;;  %v2422_v41 = vor.u32 %v2711_v38, %v2421_v36  ;;  %v2738_v36 = vld [vmem:[#allocation10 + $0x174] sm:$0xf] }
 0x1e0   : > { %v756_v51 = vadd.f32 %v755_v48, %v647_v33  ;;  %1172 = vmatmul.bf16.vlgmr.msra.gmra.mxu3 %v768_v43  ;;  %1200 = vmatmul.bf16.vlgmr.msrb.gmra.mxu1 %v768_v43  ;;  %v2590_v33 = vor.u32 %v2753_v32, %v2589_v31  ;;  %v2410_v48 = vor.u32 %v2706_v45, %v2407_v47  ;;  %v2375_v31 = vld [vmem:[#allocation10 + $0x38] sm:$0xf0]  ;;  %v2716_v32 = vld [vmem:[#allocation10 + $0xc4] sm:$0xf] }
 0x1e1   : > { %1690 = vmatpush.bf16.msra.mxu3 %v2406_v40  ;;  %1718 = vmatpush.bf16.msrb.mxu1 %v2534_v46  ;;  %v2733_v40 = vld [vmem:[#allocation10 + $0x144] sm:$0xf0]  ;;  %v2736_v47 = vld [vmem:[#allocation10 + $0x164] sm:$0xf] }
 0x1e2   : > { %v767_v58 = vmax.f32 %v756_v51, 0.0  ;;  %v2510_v42 = vor.u32 %v2733_v40, %v2509_v39  ;;  %v2501_v51 = vld [vmem:[#allocation10 + $0x130] sm:$0xf]  ;;  %v2541_v39 = vld [vmem:[#allocation10 + $0x180] sm:$0xf] }
 0x1e3   : > { %v2741_v40 = vld [vmem:[#allocation10 + $0x184] sm:$0xf0] }
 0x1e4   : > { %v769_v63 = vpack.c.bf16 %v767_v58, %v765_v57  ;;  %v2704_v58 = vld [vmem:[#allocation10 + $0x64] sm:$0xf] }
 0x1e5   : > { %1691 = vmatpush.bf16.msra.mxu3 %v2398_v55  ;;  %1719 = vmatpush.bf16.msrb.mxu1 %v2526_v56  ;;  %v2749_v55 = vld [vmem:[#allocation10 + $0x1c4] sm:$0xf0]  ;;  %v2502_v56 = vor.u32 %v2731_v53, %v2501_v51  ;;  %v2754_v51 = vld [vmem:[#allocation10 + $0x1f4] sm:$0xf] }
 0x1e6   : > { %1186 = vmatmul.bf16.vlgmr.msrb.gmra.mxu0 %v769_v63  ;;  %1214 = vmatmul.bf16.vlgmr.msrb.gmra.mxu2 %v769_v63  ;;  %v2574_v57 = vor.u32 %v2749_v55, %v2573_v54  ;;  %v2694_v54 = vld [vmem:[#allocation10 + $0x14] sm:$0xf]  ;;  %v2359_v55 = vld [vmem:[#allocation10 + $0x18] sm:$0xf0] }
 0x1e7   : > { %1704 = vmatpush.bf16.msrb.mxu0 %v2470_v61  ;;  %1732 = vmatpush.bf16.msrb.mxu2 %v2598_v62  ;;  %v2402_v61 = vor.u32 %v2704_v58, %v2399_v59  ;;  %v2471_v62 = vld [vmem:[#allocation10 + $0xf8] sm:$0xf0]  ;;  %v2431_v58 = vld [vmem:[#allocation10 + $0xa8] sm:$0xf0]  ;;  %v2734_v59 = vld [vmem:[#allocation10 + $0x154] sm:$0xf] }
 0x1e9   : > { %1692 = vmatpush.bf16.msra.mxu3 %v2390_v2  ;;  %1720 = vmatpush.bf16.msrb.mxu1 %v2518_v30  ;;  %v2565_v2 = vld [vmem:[#allocation10 + $0x1b0] sm:$0xf]  ;;  %v2550_v30 = vor.u32 %v2743_v28, %v2549_v26  ;;  %v2728_v28 = vld [vmem:[#allocation10 + $0x124] sm:$0xf] }
 0x1ea   : > { %v2566_v7 = vor.u32 %v2747_v4, %v2565_v2  ;;  %v2351_v4 = vld [vmem:[#allocation10 + $0x8] sm:$0xf0] }
 0x1eb   : > { %1705 = vmatpush.bf16.msrb.mxu0 %v2462_v5  ;;  %1733 = vmatpush.bf16.msrb.mxu2 %v2590_v33  ;;  %v2702_v5 = vld [vmem:[#allocation10 + $0x54] sm:$0xf]  ;;  %v2447_v33 = vld [vmem:[#allocation10 + $0xc8] sm:$0xf0] }
 0x1ec   : > { %v2450_v35 = vor.u32 %v2716_v32, %v2447_v33  ;;  %v2567_v32 = vld [vmem:[#allocation10 + $0x1b8] sm:$0xf0] }
 0x1ed   : > { %1693 = vmatpush.bf16.msra.mxu3 %v2382_v8  ;;  %1721 = vmatpush.bf16.msrb.mxu1 %v2510_v42  ;;  %v2394_v8 = vor.u32 %v2702_v5, %v2391_v6  ;;  %v2696_v42 = vld [vmem:[#allocation10 + $0x24] sm:$0xf]  ;;  %v2710_v5 = vld [vmem:[#allocation10 + $0x94] sm:$0xf] }
 0x1ef   : > { %1706 = vmatpush.bf16.msrb.mxu0 %v2454_v11  ;;  %v2466_v11 = vor.u32 %v2720_v9, %v2463_v10  ;;  %v2511_v9 = vld [vmem:[#allocation10 + $0x148] sm:$0xf0]  ;;  %v3467_v10 = vld [vmem:[%s3536_s8] sm:$0xf] }
 0x1f0   : > { %1228 = vmatmul.bf16.vlgmr.msrb.gmra.mxu3 %v768_v43  ;;  %1256 = vmatmul.bf16.vlgmr.msra.gmra.mxu1 %v768_v43  ;;  %v2581_v43 = vld [vmem:[#allocation10 + $0x1d0] sm:$0xf] }
 0x1f1   : > { %1694 = vmatpush.bf16.msra.mxu3 %v2374_v14  ;;  %v2582_v46 = vor.u32 %v2751_v44, %v2581_v43  ;;  %1722 = vmatpush.bf16.msrb.mxu1 %v2502_v56  ;;  %v2557_v14 = vld [vmem:[#allocation10 + $0x1a0] sm:$0xf]  ;;  %v2367_v43 = vld [vmem:[#allocation10 + $0x28] sm:$0xf0]  ;;  %v2714_v44 = vld [vmem:[#allocation10 + $0xb4] sm:$0xf] }
 0x1f2   : > { %v2558_v19 = vor.u32 %v2745_v16, %v2557_v14  ;;  %v2370_v45 = vor.u32 %v2696_v42, %v2367_v43  ;;  %v2712_v56 = vld [vmem:[#allocation10 + $0xa4] sm:$0xf]  ;;  %v2583_v14 = vld [vmem:[#allocation10 + $0x1d8] sm:$0xf0] }
 0x1f3   : > { %1707 = vmatpush.bf16.msrb.mxu0 %v2446_v17  ;;  %1734 = vmatpush.bf16.msrb.mxu2 %v2582_v46  ;;  %v2700_v17 = vld [vmem:[#allocation10 + $0x44] sm:$0xf]  ;;  %v2439_v46 = vld [vmem:[#allocation10 + $0xb8] sm:$0xf0]  ;;  %v2586_v16 = vor.u32 %v2750_v13, %v2583_v14 }
 0x1f4   : > { %v2442_v49 = vor.u32 %v2714_v44, %v2439_v46 }
 0x1f5   : > { %1695 = vmatpush.bf16.msra.mxu3 %v2366_v20  ;;  %1723 = vmatpush.bf16.msrb.mxu1 %v2494_v3  ;;  %v2386_v20 = vor.u32 %v2700_v17, %v2383_v18  ;;  %v2692_v3 = vld [vmem:[#allocation10 + $0x4] sm:$0xf]  ;;  %v2415_v18 = vld [vmem:[#allocation10 + $0x88] sm:$0xf0] }
 0x1f6   : > { %1242 = vmatmul.bf16.vlgmr.msra.gmra.mxu0 %v769_v63  ;;  %1270 = vmatmul.bf16.vlgmr.msra.gmra.mxu2 %v769_v63  ;;  %v2474_v63 = vor.u32 %v2722_v60, %v2471_v62  ;;  %v2519_v60 = vld [vmem:[#allocation10 + $0x158] sm:$0xf0]  ;;  %v2354_v6 = vor.u32 %v2692_v3, %v2351_v4  ;;  %v2708_v17 = vld [vmem:[#allocation10 + $0x84] sm:$0xf] }
 0x1f7   : > { %1708 = vmatpush.bf16.msrb.mxu0 %v2438_v21  ;;  %1735 = vmatpush.bf16.msrb.mxu2 %v2574_v57  ;;  %v2718_v21 = vld [vmem:[#allocation10 + $0xd4] sm:$0xf]  ;;  %v2362_v57 = vor.u32 %v2694_v54, %v2359_v55  ;;  %v2522_v62 = vor.u32 %v2734_v59, %v2519_v60 }
 0x1f8   : > { %v2458_v23 = vor.u32 %v2718_v21, %v2455_v22  ;;  %v2418_v22 = vor.u32 %v2708_v17, %v2415_v18 }
 0x1f9   : > { %1696 = vmatpush.bf16.msra.mxu3 %v2358_v25  ;;  %1724 = vmatpush.bf16.msrb.mxu1 %v2486_v15  ;;  %v2725_v25 = vld [vmem:[#allocation10 + $0x104] sm:$0xf0]  ;;  %v836_v15 = vperm.slane %v3467_v10, 0 }
 0x1fa   : > { %v2478_v27 = vor.u32 %v2725_v25, %v2477_v24  ;;  %v2748_v24 = vld [vmem:[#allocation10 + $0x1c4] sm:$0xf]  ;;  %v2575_v25 = vld [vmem:[#allocation10 + $0x1c8] sm:$0xf0] }
 0x1fb   : > { %1709 = vmatpush.bf16.msrb.mxu0 %v2430_v29  ;;  %1736 = vmatpush.bf16.msrb.mxu2 %v2566_v7  ;;  %v2698_v29 = vld [vmem:[#allocation10 + $0x34] sm:$0xf]  ;;  %v2423_v7 = vld [vmem:[#allocation10 + $0x98] sm:$0xf0] }
 0x1fc   : > { %v2378_v34 = vor.u32 %v2698_v29, %v2375_v31  ;;  %v2495_v29 = vld [vmem:[#allocation10 + $0x128] sm:$0xf0] }
 0x1fd   : > { %1697 = vmatpush.bf16.msra.mxu3 %v2350_v37  ;;  %v2535_v37 = vld [vmem:[#allocation10 + $0x178] sm:$0xf0]  ;;  %1725 = vmatpush.bf16.msrb.mxu1 %v2478_v27  ;;  %v2578_v27 = vor.u32 %v2748_v24, %v2575_v25 }
 0x1fe   : > { %v2538_v38 = vor.u32 %v2738_v36, %v2535_v37  ;;  %v2726_v36 = vld [vmem:[#allocation10 + $0x114] sm:$0xf] }
 0x1ff   : > { %1710 = vmatpush.bf16.msrb.mxu0 %v2422_v41  ;;  %1737 = vmatpush.bf16.msrb.mxu2 %v2558_v19  ;;  %v2542_v41 = vor.u32 %v2741_v40, %v2541_v39  ;;  %v2730_v19 = vld [vmem:[#allocation10 + $0x134] sm:$0xf]  ;;  %v2744_v39 = vld [vmem:[#allocation10 + $0x1a4] sm:$0xf]  ;;  %v2559_v40 = vld [vmem:[#allocation10 + $0x1a8] sm:$0xf0] }
 0x201   : > { %1746 = vmatpush.bf16.msrb.mxu3 %v2410_v48  ;;  %v2527_v48 = vld [vmem:[#allocation10 + $0x168] sm:$0xf0]  ;;  %1774 = vmatpush.bf16.msra.mxu1 %v2538_v38  ;;  %v2487_v38 = vld [vmem:[#allocation10 + $0x118] sm:$0xf0] }
 0x202   : > { %v2530_v50 = vor.u32 %v2736_v47, %v2527_v48  ;;  %v2490_v46 = vor.u32 %v2726_v36, %v2487_v38  ;;  %v2562_v47 = vor.u32 %v2744_v39, %v2559_v40  ;;  %v2724_v48 = vld [vmem:[#allocation10 + $0x104] sm:$0xf] }
 0x203   : > { %1711 = vmatpush.bf16.msrb.mxu0 %v2414_v52  ;;  %1738 = vmatpush.bf16.msrb.mxu2 %v2550_v30  ;;  %v2599_v52 = vld [vmem:[#allocation10 + $0x1f8] sm:$0xf0]  ;;  %v2746_v30 = vld [vmem:[#allocation10 + $0x1b4] sm:$0xf] }
 0x204   : > { %v2602_v53 = vor.u32 %v2754_v51, %v2599_v52  ;;  %v2742_v52 = vld [vmem:[#allocation10 + $0x194] sm:$0xf] }
 0x205   : > { %1747 = vmatpush.bf16.msrb.mxu3 %v2402_v61  ;;  %1775 = vmatpush.bf16.msra.mxu1 %v2530_v50  ;;  %v2434_v61 = vor.u32 %v2712_v56, %v2431_v58 }
 0x207   : > { %1760 = vmatpush.bf16.msra.mxu0 %v2474_v63  ;;  %1739 = vmatpush.bf16.msrb.mxu2 %v2542_v41  ;;  %v2752_v63 = vld [vmem:[#allocation10 + $0x1e4] sm:$0xf]  ;;  %v837_v41 = vperm.slane %v3467_v10, 1 }
 0x208   : > { %v2594_v1 = vor.u32 %v2752_v63, %v2591_v0  ;;  %v2740_v0 = vld [vmem:[#allocation10 + $0x184] sm:$0xf] }
 0x209   : > { %1748 = vmatpush.bf16.msrb.mxu3 %v2394_v8  ;;  %v2732_v8 = vld [vmem:[#allocation10 + $0x144] sm:$0xf]  ;;  %1776 = vmatpush.bf16.msra.mxu1 %v2522_v62 }
 0x20a   : > { %v2514_v12 = vor.u32 %v2732_v8, %v2511_v9 }
 0x20b   : > { %1761 = vmatpush.bf16.msra.mxu0 %v2466_v11  ;;  %1788 = vmatpush.bf16.msra.mxu2 %v2602_v53  ;;  %v2426_v11 = vor.u32 %v2710_v5, %v2423_v7  ;;  %v2551_v53 = vld [vmem:[#allocation10 + $0x198] sm:$0xf0] }
 0x20c   : > { %v2554_v60 = vor.u32 %v2742_v52, %v2551_v53 }
 0x20d   : > { %1749 = vmatpush.bf16.msrb.mxu3 %v2386_v20  ;;  %1777 = vmatpush.bf16.msra.mxu1 %v2514_v12  ;;  %v839_v12 = vperm.slane %v3467_v10, 3 }
 0x20f   : > { %1762 = vmatpush.bf16.msra.mxu0 %v2458_v23  ;;  %1789 = vmatpush.bf16.msra.mxu2 %v2594_v1  ;;  %v2503_v23 = vld [vmem:[#allocation10 + $0x138] sm:$0xf0]  ;;  %v2543_v1 = vld [vmem:[#allocation10 + $0x188] sm:$0xf0] }
 0x210   : > { %v2506_v26 = vor.u32 %v2730_v19, %v2503_v23  ;;  %v2546_v7 = vor.u32 %v2740_v0, %v2543_v1 }
 0x211   : > { %1750 = vmatpush.bf16.msrb.mxu3 %v2378_v34  ;;  %v2498_v34 = vor.u32 %v2728_v28, %v2495_v29 }
 0x212   : > { %1778 = vmatpush.bf16.msra.mxu1 %v2506_v26 }
 0x213   : > { %1763 = vmatpush.bf16.msra.mxu0 %v2450_v35  ;;  %1790 = vmatpush.bf16.msra.mxu2 %v2586_v16  ;;  %v2570_v35 = vor.u32 %v2746_v30, %v2567_v32  ;;  %v1364_v30 = vld [vmem:[%s3538_s10] sm:$0x3] }
 0x214   : > { %v1366_v32 = vperm.slane %v1364_v30, 0 }
 0x215   : > { %1751 = vmatpush.bf16.msrb.mxu3 %v2370_v45 }
 0x216   : > { %1779 = vmatpush.bf16.msra.mxu1 %v2498_v34 }
 0x217   : > { %1764 = vmatpush.bf16.msra.mxu0 %v2442_v49  ;;  %1791 = vmatpush.bf16.msra.mxu2 %v2578_v27  ;;  %v2479_v49 = vld [vmem:[#allocation10 + $0x108] sm:$0xf0] }
 0x218   : > { %v2482_v58 = vor.u32 %v2724_v48, %v2479_v49 }
 0x219   : > { %1752 = vmatpush.bf16.msrb.mxu3 %v2362_v57 }
 0x21a   : > { %1780 = vmatpush.bf16.msra.mxu1 %v2490_v46 }
 0x21b   : > { %1765 = vmatpush.bf16.msra.mxu0 %v2434_v61  ;;  %1792 = vmatpush.bf16.msra.mxu2 %v2570_v35 }
 0x21d   : > { %1753 = vmatpush.bf16.msrb.mxu3 %v2354_v6  ;;  %v838_v6 = vperm.slane %v3467_v10, 2 }
 0x21e   : > { %1781 = vmatpush.bf16.msra.mxu1 %v2482_v58 }
 0x21f   : > { %1766 = vmatpush.bf16.msra.mxu0 %v2426_v11  ;;  %1793 = vmatpush.bf16.msra.mxu2 %v2562_v47 }
 0x223   : > { %1767 = vmatpush.bf16.msra.mxu0 %v2418_v22  ;;  %1794 = vmatpush.bf16.msra.mxu2 %v2554_v60 }
 0x227   : > { %1795 = vmatpush.bf16.msra.mxu2 %v2546_v7 }
 0x25d   : > { %v1201_v2 = vpop.f32.mrf.mxu1 }
 0x25e   : > { %v1202_v50 = vadd.f32 %v1201_v2, %v837_v41 }
 0x263   : > { %v1173_v20 = vpop.f32.mrf.mxu3  ;;  %v1187_v21 = vpop.f32.mrf.mxu0 }
 0x264   : > { %v1174_v31 = vadd.f32 %v1173_v20, %v836_v15 }
 0x265   : > { %v1203_v33 = vpop.f32.mrf.mxu1 }
 0x266   : > { %v1188_v42 = vadd.f32 %v1187_v21, %v1174_v31  ;;  %v1204_v54 = vadd.f32 %v1203_v33, %v837_v41 }
 0x268   : > { %v1288_v55 = vmax.f32 %v1188_v42, 0.0 }
 0x269   : > { %v1215_v37 = vpop.f32.mrf.mxu2 }
 0x26a   : > { %v1216_v56 = vadd.f32 %v1215_v37, %v1202_v50 }
 0x26b   : > { %v1175_v43 = vpop.f32.mrf.mxu3  ;;  %v1189_v44 = vpop.f32.mrf.mxu0 }
 0x26c   : > { %v1176_v45 = vadd.f32 %v1175_v43, %v836_v15  ;;  %v1289_v2 = vmax.f32 %v1216_v56, 0.0 }
 0x26d   : > { %v1257_v62 = vpop.f32.mrf.mxu1 }
 0x26e   : > { %v1190_v51 = vadd.f32 %v1189_v44, %v1176_v45  ;;  %v1258_v18 = vadd.f32 %v1257_v62, %v839_v12  ;;  %v1367_v45 = vperm.slane %v1364_v30, 1 }
 0x270   : > { %v1292_v57 = vmax.f32 %v1190_v51, 0.0 }
 0x271   : > { %v1217_v59 = vpop.f32.mrf.mxu2 }
 0x272   : > { %v1296_v61 = vpack.c.bf16 %v1292_v57, %v1288_v55  ;;  %v1218_v63 = vadd.f32 %v1217_v59, %v1204_v54 }
 0x273   : > { %v1229_v3 = vpop.f32.mrf.mxu3  ;;  %v1243_v4 = vpop.f32.mrf.mxu0 }
 0x274   : > { %v1293_v5 = vmax.f32 %v1218_v63, 0.0  ;;  %1698 = vmatmul.bf16.vlgmr.msra.gmra.mxu3 %v1296_v61  ;;  %v1230_v9 = vadd.f32 %v1229_v3, %v838_v6 }
 0x275   : > { %v1259_v16 = vpop.f32.mrf.mxu1 }
 0x276   : > { %v1297_v8 = vpack.c.bf16 %v1293_v5, %v1289_v2  ;;  %v1244_v14 = vadd.f32 %v1243_v4, %v1230_v9  ;;  %v1260_v21 = vadd.f32 %v1259_v16, %v839_v12 }
 0x278   : > { %1712 = vmatmul.bf16.vlgmr.msrb.gmra.mxu0 %v1297_v8  ;;  %v1290_v20 = vmax.f32 %v1244_v14, 0.0 }
 0x279   : > { %v1271_v11 = vpop.f32.mrf.mxu2 }
 0x27a   : > { %v1272_v22 = vadd.f32 %v1271_v11, %v1258_v18 }
 0x27b   : > { %v1231_v13 = vpop.f32.mrf.mxu3  ;;  %v1245_v17 = vpop.f32.mrf.mxu0 }
 0x27c   : > { %v1232_v15 = vadd.f32 %v1231_v13, %v838_v6  ;;  %v1291_v27 = vmax.f32 %v1272_v22, 0.0 }
 0x27e   : > { %v1246_v19 = vadd.f32 %v1245_v17, %v1232_v15 }
 0x280   : > { %v1294_v23 = vmax.f32 %v1246_v19, 0.0 }
 0x281   : > { %v1273_v24 = vpop.f32.mrf.mxu2 }
 0x282   : > { %v1298_v25 = vpack.c.bf16 %v1294_v23, %v1290_v20  ;;  %v1274_v26 = vadd.f32 %v1273_v24, %v1260_v21 }
 0x284   : > { %v1295_v28 = vmax.f32 %v1274_v26, 0.0  ;;  %1726 = vmatmul.bf16.vlgmr.msrb.gmra.mxu1 %v1298_v25  ;;  %1754 = vmatmul.bf16.vlgmr.msrb.gmra.mxu3 %v1296_v61 }
 0x286   : > { %v1299_v29 = vpack.c.bf16 %v1295_v28, %v1291_v27 }
 0x288   : > { %1740 = vmatmul.bf16.vlgmr.msrb.gmra.mxu2 %v1299_v29  ;;  %1768 = vmatmul.bf16.vlgmr.msra.gmra.mxu0 %v1297_v8 }
 0x294   : > { %1782 = vmatmul.bf16.vlgmr.msra.gmra.mxu1 %v1298_v25 }
 0x298   : > { %1796 = vmatmul.bf16.vlgmr.msra.gmra.mxu2 %v1299_v29 }
 0x2f5   : > { %v1713_v31 = vpop.f32.mrf.mxu0 }
 0x2f7   : > { %v1699_v10 = vpop.f32.mrf.mxu3 }
 0x2f8   : > { %v1700_v34 = vadd.f32 %v1699_v10, %v1366_v32 }
 0x2fa   : > { %v1714_v36 = vadd.f32 %v1713_v31, %v1700_v34 }
 0x2fd   : > { %v1715_v37 = vpop.f32.mrf.mxu0 }
 0x2ff   : > { %v1701_v35 = vpop.f32.mrf.mxu3 }
 0x300   : > { %v1702_v41 = vadd.f32 %v1701_v35, %v1366_v32 }
 0x301   : > { %v1727_v33 = vpop.f32.mrf.mxu1 }
 0x302   : > { %v1728_v38 = vadd.f32 %v1727_v33, %v1714_v36  ;;  %v1716_v46 = vadd.f32 %v1715_v37, %v1702_v41 }
 0x305   : > { %v1769_v51 = vpop.f32.mrf.mxu0 }
 0x307   : > { %v1755_v44 = vpop.f32.mrf.mxu3 }
 0x308   : > { %v1756_v49 = vadd.f32 %v1755_v44, %v1367_v45 }
 0x309   : > { %v1729_v39 = vpop.f32.mrf.mxu1 }
 0x30a   : > { %v1730_v47 = vadd.f32 %v1729_v39, %v1716_v46  ;;  %v1770_v54 = vadd.f32 %v1769_v51, %v1756_v49 }
 0x30b   : > { %v1741_v40 = vpop.f32.mrf.mxu2 }
 0x30c   : > { %v1742_v42 = vadd.f32 %v1741_v40, %v1728_v38 }
 0x30d   : > { %v1771_v61 = vpop.f32.mrf.mxu0 }
 0x30e   : > { %v1802_v43 = vmax.f32 %v1742_v42, 0.0 }
 0x30f   : > { %v1757_v55 = vpop.f32.mrf.mxu3 }
 0x310   : > { %v1758_v58 = vadd.f32 %v1757_v55, %v1367_v45 }
 0x311   : > { %v1783_v52 = vpop.f32.mrf.mxu1 }
 0x312   : > { %v1784_v56 = vadd.f32 %v1783_v52, %v1770_v54  ;;  %v1772_v63 = vadd.f32 %v1771_v61, %v1758_v58 }
 0x313   : > { %v1743_v48 = vpop.f32.mrf.mxu2 }
 0x314   : > { %v1744_v50 = vadd.f32 %v1743_v48, %v1730_v47 }
 0x316   : > { %v1804_v53 = vmax.f32 %v1744_v50, 0.0 }
 0x319   : > { %v1785_v62 = vpop.f32.mrf.mxu1 }
 0x31a   : > { %v1786_v0 = vadd.f32 %v1785_v62, %v1772_v63 }
 0x31b   : > { %v1797_v57 = vpop.f32.mrf.mxu2 }
 0x31c   : > { %v1798_v59 = vadd.f32 %v1797_v57, %v1784_v56 }
 0x31e   : > { %v1803_v60 = vmax.f32 %v1798_v59, 0.0 }
 0x322   : > { %1809 = sbr.rel (%p2603_p4) target bundleno = 811 (0x32b), region = 88 }
 0x323   : > { %v1799_v1 = vpop.f32.mrf.mxu2 }
 0x324   : > { %v1800_v3 = vadd.f32 %v1799_v1, %v1786_v0 }
 0x326   : > { %v1805_v4 = vmax.f32 %v1800_v3, 0.0 }
 0x327   : > { %v1810_v2 = vlaneseq  ;;  %v3166_v5 = vmov 0.0  }
 0x329   : > { %vm1812_vm1 = vcmp.lt.s32.totalorder %v1810_v2, 256 }
 0x32a   : > { %1814 = vst.msk [vmem:[%s3477_s16] sm:$0x3] %vm1812_vm1, %v3166_v5 }
 0x32b PF: > { %v1815_v6 = vmax.f32 %v1802_v43, %v1804_v53  ;;  %v1822_v7 = vmax.f32 %v1803_v60, %v1805_v4  ;;  %s2605_s20 = sshll.u32 %s3138_s21, 1  ;;  %v1837_v21 = vlaneseq  ;;  %vm1833_vm2 = vcmask 1040384   ;;  %s1857_s19 = sshll.u32 %s3477_s16, 4  ;;  %s1858_s19 = int_to_ptr.vmem [resolvable:$true] %s1857_s19 }
 0x32c   : > { %s1855_s26 = scalar_lea.hbm %s3539_s11, %s2605_s20  ;;  %s1843_s21 = scalar_lea.sflag [#allocation4], %s498_s12 }
 0x32d   : > { %v1816_v8 = vrot.slane %v1815_v6, 4  ;;  %v1823_v9 = vrot.slane %v1822_v7, 4  ;;  %s1859_s22 = sshll.u32 %s1855_s26, 4  ;;  %vm1839_vm3 = vcmp.lt.s32.totalorder %v1837_v21, 256  ;;  %s3064_s30 = scalar_lea.hbm %s3539_s11, 4  ;;  %s1860_s22 = int_to_ptr.hbm [resolvable:$true] %s1859_s22 }
 0x32e   : > { %s3058_s24 = sshra.s32 %s1860_s22, 4  ;;  %s3059_s24 = int_to_ptr.hbm [resolvable:$true] %s3058_s24 }
 0x32f   : > { %v1817_v11 = vmax.f32 %v1815_v6, %v1816_v8  ;;  %v1824_v12 = vmax.f32 %v1822_v7, %v1823_v9  ;;  %s3060_s29 = scalar_lea.hbm %s3059_s24, 2  ;;  %p3065_p8 = scmp.lt.s32.totalorder %s3059_s24, %s3539_s11 }
 0x330   : > { %p3061_p5 = scmp.ne.s32.totalorder %s3059_s24, %s3060_s29  ;;  %p3066_p10 = scmp.lt.s32.totalorder %s3064_s30, %s3060_s29 }
 0x331   : > { %v1818_v13 = vrot.slane %v1817_v11, 2  ;;  %v1825_v14 = vrot.slane %v1824_v12, 2  ;;  %v1829_v22 = vld [vmem:[%s3477_s16] sm:$0x3] }
 0x332   : > { %p3062_p6 = pnand %p3061_p5, %p3277_p3  ;;  %p3067_p11 = por %p3066_p10, %p3065_p8 }
 0x333   : > { %v1819_v15 = vmax.f32 %v1817_v11, %v1818_v13  ;;  %v1826_v16 = vmax.f32 %v1824_v12, %v1825_v14 }
 0x334   : > { %p3063_p7 = pneg %p3062_p6 }
 0x335   : > { %v1820_v17 = vrot.slane %v1819_v15, 1  ;;  %v1827_v18 = vrot.slane %v1826_v16, 1 }
 0x336   : > { %p3068_p12 = pnand %p3067_p11, %p3063_p7 }
 0x337   : > { %v1821_v19 = vmax.f32 %v1819_v15, %v1820_v17  ;;  %v1828_v20 = vmax.f32 %v1826_v16, %v1827_v18 }
 0x339   : > { %v1832_v23 = vrot.slane %v1828_v20, 7 }
 0x33b   : > { %v1834_v24 = vsel %vm1833_vm2, %v1821_v19, %v1832_v23 }
 0x33c   : > { %v1836_v25 = vmax.f32 %v1829_v22, %v1834_v24 }
 0x33e   : > { %1841 = vst.msk [vmem:[%s3477_s16] sm:$0x3] %vm1839_vm3, %v1836_v25 }
 0x33f   : > { %3071 = shalt.err (!%p3068_p12)
}
 0x340   : > { %2776 = dma.vmem_to_hbm [thread:$0]  (%p3277_p3), %s1858_s19, 32, %s1860_s22, %s1843_s21  }
 0x341 PF: > { %s3568_s12 = sld [smem:[#allocation20_spill]] }
 0x342   : > { %s3569_s28 = sld [smem:[#allocation16_spill]] }
 0x347   : > { %p2808_p13 = scmp.ge.s32.totalorder %s3568_s12, 2 }
 0x348   : > { %s1871_s16 = sand.u32 1, %s3569_s28  }
 0x349   : > { %p2795_p0 = pnand %p2808_p13, %p3287_p9  ;;  %s1872_s20 = scalar_lea.sflag [#allocation4], %s1871_s16 }
 0x34b   : > { %p2796_p1 = pneg %p2795_p0 }
 0x34d   : > { %3117 = dma.done.wait (%p2796_p1), %s1872_s20, 32  }
 0x34e   : > { %3119 = vsyncadd (%p2796_p1), %s1872_s20, 4294967264  ;;  %s27_s24 = sadd.s32 1, %s3568_s12   ;;  %s3571_s15 = sld [smem:[#allocation17_spill]] }
 0x34f   : > { %p24_p2 = scmp.ge.s32.totalorder %s27_s24, 10   ;;  %s3572_s19 = sld [smem:[#allocation25_spill]] }
 0x350   : > { %s3573_s20 = sld [smem:[#allocation18_spill]]  ;;  %s3577_s17 = smov %s3126_s18 }
 0x351   : > { %s3574_s21 = sld [smem:[#allocation19_spill]]  ;;  %26 = sbr.rel (!%p24_p2) target bundleno = 10 (0xa), region = 124 }
 0x352   : > { %s3575_s22 = sld [smem:[#allocation21_spill]] }
 0x353   : > { %s3576_s23 = sld [smem:[#allocation23_spill]] }
 0x354   : > { %s3578_s18 = smov %s3571_s15 }
 0x356   :  { %1878 = vsyncpa [#allocation3], 1 }
 0x357   :  { %1880 = vsyncpa [#allocation3 + $0x1], 1 }
 0x358   :  { %1881 = vsyncpa [#allocation6], 1 }
 0x359   :  { %1882 = vsyncpa [#allocation9], 1 }
 0x35a   :  { %1883 = vsyncpa [#allocation4], 1 }
 0x35b   :  { %1885 = vsyncpa [#allocation4 + $0x1], 1 }

</bundles_post_ra>
